<compile_context>
chip_gen: v6e
topology: v6e:2x2x1
jax: 0.10.0
libtpu: 0.0.40
codegen_flags: <defaults>
</compile_context>

<pallas_src>
import functools

import jax
import jax.numpy as jnp
from jax.experimental import pallas as pl
from jax.experimental.pallas import tpu as pltpu


# ---------------- config (shapes implied by the module) ----------------------
class Config:
    batch_size = 2
    robot_joint_dim = 7
    action_dim = 4
    hidden_size = 512


def _round_up(x, m):
    return (x + m - 1) // m * m


def _large_tile_m():
    """Per-generation M tile for the large-batch path (unused at batch=2)."""
    try:
        kind = jax.devices()[0].device_kind.lower()
    except Exception:
        kind = ""
    if "v5e" in kind or "v5 lite" in kind or "v5litepod" in kind:
        return 128   # 128x128 MXU, 1 vst slot: avoid 256x512 f32 spills
    return 256       # v6e / v7x: match the 256-wide MXU


# ---------------- Pallas kernel: fused 4-layer MLP ---------------------------
def _mlp_kernel(x_ref, w1_ref, b1_ref,
                w2_ref, s2_ref, b2_ref,
                w3_ref, s3_ref, b3_ref,
                w4_ref, b4_ref, o_ref):
    # Layer 1: bf16 GEMM (K padded only to 16) + fused bias + ReLU.
    h = jnp.dot(x_ref[...], w1_ref[...], preferred_element_type=jnp.float32)
    h = jnp.maximum(h + b1_ref[...], 0.0)

    # Layer 2: int8 weight dequantized to bf16 in-kernel; per-output-channel
    # scale applied in the f32 epilogue (dot(h, Wq) * s == dot(h, Wq * s)).
    w2 = w2_ref[...].astype(jnp.float32).astype(jnp.bfloat16)
    h = jnp.dot(h.astype(jnp.bfloat16), w2, preferred_element_type=jnp.float32)
    h = jnp.maximum(h * s2_ref[...] + b2_ref[...], 0.0)

    # Layer 3: same weight-only int8 scheme.
    w3 = w3_ref[...].astype(jnp.float32).astype(jnp.bfloat16)
    h = jnp.dot(h.astype(jnp.bfloat16), w3, preferred_element_type=jnp.float32)
    h = jnp.maximum(h * s3_ref[...] + b3_ref[...], 0.0)

    # Output layer: bf16 GEMM + bias, no activation (128-lane padded output).
    out = jnp.dot(h.astype(jnp.bfloat16), w4_ref[...],
                  preferred_element_type=jnp.float32)
    o_ref[...] = out + b4_ref[...]


def joint_pos_predictor_forward(prepped, cf, joints, action):
    """Pallas forward for JointPosPredictor: out = MLP(cat([joints, action], 1))."""
    B, jd = joints.shape
    _, ad = action.shape
    K1p = prepped["w1"].shape[0]          # padded input dim (16-aligned)
    H = prepped["w2"].shape[0]            # hidden size (512, lane-dense)
    Noutp = prepped["w4"].shape[1]        # padded output dim (multiple of 128)
    out_dim = cf.robot_joint_dim

    # Pad/tile the batch (sublane) dimension.  The grid only exceeds one tile
    # for genuinely large batches, so the megacore split never forces a second
    # per-core copy of the weights in the DMA-bound small-batch regime.
    Mp = _round_up(B, 8)
    if Mp > 256:
        TM = _large_tile_m()
        Mp = _round_up(Mp, TM)
    else:
        TM = Mp

    # Build the padded, concatenated input directly (single (Mp, 16) buffer —
    # no separate jnp.concatenate copy and no 128-wide zero padding).
    x = jnp.zeros((Mp, K1p), jnp.bfloat16)
    x = x.at[:B, :jd].set(joints.astype(jnp.bfloat16))
    x = x.at[:B, jd:jd + ad].set(action.astype(jnp.bfloat16))

    # Advisory cost estimate: lets XLA overlap this short, DMA-dominated call.
    flops = 2 * Mp * (K1p * H + 2 * H * H + H * Noutp)
    bytes_accessed = (
        Mp * K1p * 2                       # x (bf16)
        + K1p * H * 2 + H * 4              # W1 bf16 + b1 f32
        + 2 * (H * H * 1 + H * 4 + H * 4)  # W2/W3 int8 + scales + biases
        + H * Noutp * 2 + Noutp * 4        # W4 bf16 + b4 f32
        + Mp * Noutp * 4                   # output f32
    )

    const = lambda i: (0, 0)              # weights/biases/scales: DMAed once
    out = pl.pallas_call(
        _mlp_kernel,
        out_shape=jax.ShapeDtypeStruct((Mp, Noutp), jnp.float32),
        grid_spec=pltpu.PrefetchScalarGridSpec(
            num_scalar_prefetch=0,
            grid=(Mp // TM,),
            in_specs=[
                pl.BlockSpec((TM, K1p), lambda i: (i, 0)),   # activations
                pl.BlockSpec((K1p, H), const),               # W1 (bf16, 16 rows)
                pl.BlockSpec((1, H), const),                 # b1 (f32)
                pl.BlockSpec((H, H), const),                 # W2 (int8)
                pl.BlockSpec((1, H), const),                 # s2 (f32, per-col)
                pl.BlockSpec((1, H), const),                 # b2 (f32)
                pl.BlockSpec((H, H), const),                 # W3 (int8)
                pl.BlockSpec((1, H), const),                 # s3 (f32, per-col)
                pl.BlockSpec((1, H), const),                 # b3 (f32)
                pl.BlockSpec((H, Noutp), const),             # W4 (bf16, padded)
                pl.BlockSpec((1, Noutp), const),             # b4 (f32, padded)
            ],
            out_specs=pl.BlockSpec((TM, Noutp), lambda i: (i, 0)),
        ),
        compiler_params=pltpu.CompilerParams(
            dimension_semantics=("parallel",)),
        cost_estimate=pl.CostEstimate(
            flops=flops, transcendentals=0, bytes_accessed=bytes_accessed),
    )(x, prepped["w1"], prepped["b1"],
      prepped["w2"], prepped["s2"], prepped["b2"],
      prepped["w3"], prepped["s3"], prepped["b3"],
      prepped["w4"], prepped["b4"])

    return out[:B, :out_dim]


# ---------------- deterministic parameter init --------------------------------
def init_params(cf, key):
    """nn.Linear-style uniform(-1/sqrt(fan_in), 1/sqrt(fan_in)) init."""
    in_dim = cf.robot_joint_dim + cf.action_dim
    dims = [(in_dim, cf.hidden_size),
            (cf.hidden_size, cf.hidden_size),
            (cf.hidden_size, cf.hidden_size),
            (cf.hidden_size, cf.robot_joint_dim)]
    params = []
    for fan_in, fan_out in dims:
        key, kw, kb = jax.random.split(key, 3)
        bound = float(1.0 / (fan_in ** 0.5))
        w = jax.random.uniform(kw, (fan_in, fan_out), jnp.float32, -bound, bound)
        b = jax.random.uniform(kb, (fan_out,), jnp.float32, -bound, bound)
        params.append({"w": w, "b": b})
    return params


def _quantize_int8_per_col(w):
    """Symmetric per-output-channel int8 quantization of a (K, N) weight."""
    absmax = jnp.max(jnp.abs(w), axis=0, keepdims=True)          # (1, N)
    scale = jnp.maximum(absmax / 127.0, 1e-8).astype(jnp.float32)
    q = jnp.clip(jnp.round(w / scale), -127.0, 127.0).astype(jnp.int8)
    return q, scale


def prepare_params(params):
    """Pad / cast / quantize weights ONCE (weights are static)."""
    w1, b1 = params[0]["w"], params[0]["b"]
    K1, H = w1.shape
    K1p = _round_up(K1, 16)   # bf16 sublane pack; no 128-wide zero rows
    w1p = jnp.zeros((K1p, H), jnp.float32).at[:K1, :].set(w1).astype(jnp.bfloat16)

    w2q, s2 = _quantize_int8_per_col(params[1]["w"])
    w3q, s3 = _quantize_int8_per_col(params[2]["w"])

    w4, b4 = params[3]["w"], params[3]["b"]
    Nout = w4.shape[1]
    Noutp = _round_up(Nout, 128)
    w4p = jnp.zeros((H, Noutp), jnp.float32).at[:, :Nout].set(w4).astype(jnp.bfloat16)
    b4p = jnp.zeros((1, Noutp), jnp.float32).at[0, :Nout].set(b4)

    return {
        "w1": w1p, "b1": b1[None, :].astype(jnp.float32),
        "w2": w2q, "s2": s2, "b2": params[1]["b"][None, :].astype(jnp.float32),
        "w3": w3q, "s3": s3, "b3": params[2]["b"][None, :].astype(jnp.float32),
        "w4": w4p, "b4": b4p,
    }


# ---------------- main ---------------------------------------------------------
if __name__ == "__main__":
    cf = Config()
    params = init_params(cf, jax.random.PRNGKey(42))
    prepped = prepare_params(params)

    key = jax.random.PRNGKey(0)
    kj, ka = jax.random.split(key)
    joints = jax.random.normal(kj, (cf.batch_size, cf.robot_joint_dim), jnp.float32)
    action = jax.random.normal(ka, (cf.batch_size, cf.action_dim), jnp.float32)

    fwd = jax.jit(functools.partial(joint_pos_predictor_forward, prepped, cf))
    out = fwd(joints, action)
    jax.block_until_ready(out)

    assert out.shape == (cf.batch_size, cf.robot_joint_dim), out.shape
    assert out.dtype == jnp.float32

    # Sanity check against a plain-JAX f32 reference (bf16 activations + int8
    # weight-only quantization in the kernel -> relaxed tolerance).
    x_ref = jnp.concatenate([joints, action], axis=1)
    h_ref = x_ref
    for li in range(3):
        h_ref = jnp.maximum(h_ref @ params[li]["w"] + params[li]["b"], 0.0)
    ref = h_ref @ params[3]["w"] + params[3]["b"]
    err = float(jnp.max(jnp.abs(out - ref)))
    assert err < 5e-2, err

    print("KERNEL_OK")
</pallas_src>

<mosaic_0001>
module attributes {stable_mosaic.version = 11 : i64} {
  func.func @_mlp_kernel(%arg0: i32, %arg1: memref<8x16xbf16, #tpu.memory_space<vmem>>, %arg2: memref<16x512xbf16, #tpu.memory_space<vmem>>, %arg3: memref<1x512xf32, #tpu.memory_space<vmem>>, %arg4: memref<512x512xi8, #tpu.memory_space<vmem>>, %arg5: memref<1x512xf32, #tpu.memory_space<vmem>>, %arg6: memref<1x512xf32, #tpu.memory_space<vmem>>, %arg7: memref<512x512xi8, #tpu.memory_space<vmem>>, %arg8: memref<1x512xf32, #tpu.memory_space<vmem>>, %arg9: memref<1x512xf32, #tpu.memory_space<vmem>>, %arg10: memref<512x128xbf16, #tpu.memory_space<vmem>>, %arg11: memref<1x128xf32, #tpu.memory_space<vmem>>, %arg12: memref<8x128xf32, #tpu.memory_space<vmem>>) attributes {dimension_semantics = [#tpu.dimension_semantics<parallel>], iteration_bounds = array<i64: 1>, scalar_prefetch = 0 : i64, scratch_operands = 0 : i64, tpu.core_type = #tpu.core_type<tc>, window_params = [{transform_indices = @transform_0, window_bounds = array<i64: 8, 16>}, {pipeline_mode = #tpu.pipeline_mode<synchronous>, transform_indices = @transform_1, window_bounds = array<i64: 16, 512>}, {pipeline_mode = #tpu.pipeline_mode<synchronous>, transform_indices = @transform_2, window_bounds = array<i64: 1, 512>}, {pipeline_mode = #tpu.pipeline_mode<synchronous>, transform_indices = @transform_3, window_bounds = array<i64: 512, 512>}, {pipeline_mode = #tpu.pipeline_mode<synchronous>, transform_indices = @transform_4, window_bounds = array<i64: 1, 512>}, {pipeline_mode = #tpu.pipeline_mode<synchronous>, transform_indices = @transform_5, window_bounds = array<i64: 1, 512>}, {pipeline_mode = #tpu.pipeline_mode<synchronous>, transform_indices = @transform_6, window_bounds = array<i64: 512, 512>}, {pipeline_mode = #tpu.pipeline_mode<synchronous>, transform_indices = @transform_7, window_bounds = array<i64: 1, 512>}, {pipeline_mode = #tpu.pipeline_mode<synchronous>, transform_indices = @transform_8, window_bounds = array<i64: 1, 512>}, {pipeline_mode = #tpu.pipeline_mode<synchronous>, transform_indices = @transform_9, window_bounds = array<i64: 512, 128>}, {pipeline_mode = #tpu.pipeline_mode<synchronous>, transform_indices = @transform_10, window_bounds = array<i64: 1, 128>}, {transform_indices = @transform_11, window_bounds = array<i64: 8, 128>}]} {
    %c0 = arith.constant 0 : index
    %c0_0 = arith.constant 0 : index
    %0 = vector.load %arg1[%c0, %c0_0] : memref<8x16xbf16, #tpu.memory_space<vmem>>, vector<8x16xbf16>
    %c0_1 = arith.constant 0 : index
    %c0_2 = arith.constant 0 : index
    %1 = vector.load %arg2[%c0_1, %c0_2] : memref<16x512xbf16, #tpu.memory_space<vmem>>, vector<16x512xbf16>
    %cst = arith.constant dense<0.000000e+00> : vector<8x512xf32>
    %2 = tpu.matmul %0, %1, %cst {dimension_numbers = #tpu.dot_dimension_numbers<[1], [0], [0], [1], [0, 0, 1, 1], [], []>} : vector<8x16xbf16>, vector<16x512xbf16>, vector<8x512xf32> -> vector<8x512xf32>
    %c0_3 = arith.constant 0 : index
    %c0_4 = arith.constant 0 : index
    %3 = vector.load %arg3[%c0_3, %c0_4] : memref<1x512xf32, #tpu.memory_space<vmem>>, vector<1x512xf32>
    %4 = vector.broadcast %3 : vector<1x512xf32> to vector<8x512xf32>
    %5 = arith.addf %2, %4 : vector<8x512xf32>
    %cst_5 = arith.constant 0.000000e+00 : f32
    %6 = vector.broadcast %cst_5 : f32 to vector<8x512xf32>
    %7 = arith.maximumf %5, %6 : vector<8x512xf32>
    %c0_6 = arith.constant 0 : index
    %c0_7 = arith.constant 0 : index
    %8 = vector.load %arg4[%c0_6, %c0_7] : memref<512x512xi8, #tpu.memory_space<vmem>>, vector<512x512xi8>
    %9 = arith.sitofp %8 : vector<512x512xi8> to vector<512x512xf32>
    %10 = arith.truncf %9 : vector<512x512xf32> to vector<512x512xbf16>
    %11 = arith.truncf %7 : vector<8x512xf32> to vector<8x512xbf16>
    %cst_8 = arith.constant dense<0.000000e+00> : vector<8x512xf32>
    %12 = tpu.matmul %11, %10, %cst_8 {dimension_numbers = #tpu.dot_dimension_numbers<[1], [0], [0], [1], [0, 0, 1, 1], [], []>} : vector<8x512xbf16>, vector<512x512xbf16>, vector<8x512xf32> -> vector<8x512xf32>
    %c0_9 = arith.constant 0 : index
    %c0_10 = arith.constant 0 : index
    %13 = vector.load %arg5[%c0_9, %c0_10] : memref<1x512xf32, #tpu.memory_space<vmem>>, vector<1x512xf32>
    %14 = vector.broadcast %13 : vector<1x512xf32> to vector<8x512xf32>
    %15 = arith.mulf %12, %14 : vector<8x512xf32>
    %c0_11 = arith.constant 0 : index
    %c0_12 = arith.constant 0 : index
    %16 = vector.load %arg6[%c0_11, %c0_12] : memref<1x512xf32, #tpu.memory_space<vmem>>, vector<1x512xf32>
    %17 = vector.broadcast %16 : vector<1x512xf32> to vector<8x512xf32>
    %18 = arith.addf %15, %17 : vector<8x512xf32>
    %cst_13 = arith.constant 0.000000e+00 : f32
    %19 = vector.broadcast %cst_13 : f32 to vector<8x512xf32>
    %20 = arith.maximumf %18, %19 : vector<8x512xf32>
    %c0_14 = arith.constant 0 : index
    %c0_15 = arith.constant 0 : index
    %21 = vector.load %arg7[%c0_14, %c0_15] : memref<512x512xi8, #tpu.memory_space<vmem>>, vector<512x512xi8>
    %22 = arith.sitofp %21 : vector<512x512xi8> to vector<512x512xf32>
    %23 = arith.truncf %22 : vector<512x512xf32> to vector<512x512xbf16>
    %24 = arith.truncf %20 : vector<8x512xf32> to vector<8x512xbf16>
    %cst_16 = arith.constant dense<0.000000e+00> : vector<8x512xf32>
    %25 = tpu.matmul %24, %23, %cst_16 {dimension_numbers = #tpu.dot_dimension_numbers<[1], [0], [0], [1], [0, 0, 1, 1], [], []>} : vector<8x512xbf16>, vector<512x512xbf16>, vector<8x512xf32> -> vector<8x512xf32>
    %c0_17 = arith.constant 0 : index
    %c0_18 = arith.constant 0 : index
    %26 = vector.load %arg8[%c0_17, %c0_18] : memref<1x512xf32, #tpu.memory_space<vmem>>, vector<1x512xf32>
    %27 = vector.broadcast %26 : vector<1x512xf32> to vector<8x512xf32>
    %28 = arith.mulf %25, %27 : vector<8x512xf32>
    %c0_19 = arith.constant 0 : index
    %c0_20 = arith.constant 0 : index
    %29 = vector.load %arg9[%c0_19, %c0_20] : memref<1x512xf32, #tpu.memory_space<vmem>>, vector<1x512xf32>
    %30 = vector.broadcast %29 : vector<1x512xf32> to vector<8x512xf32>
    %31 = arith.addf %28, %30 : vector<8x512xf32>
    %cst_21 = arith.constant 0.000000e+00 : f32
    %32 = vector.broadcast %cst_21 : f32 to vector<8x512xf32>
    %33 = arith.maximumf %31, %32 : vector<8x512xf32>
    %34 = arith.truncf %33 : vector<8x512xf32> to vector<8x512xbf16>
    %c0_22 = arith.constant 0 : index
    %c0_23 = arith.constant 0 : index
    %35 = vector.load %arg10[%c0_22, %c0_23] : memref<512x128xbf16, #tpu.memory_space<vmem>>, vector<512x128xbf16>
    %cst_24 = arith.constant dense<0.000000e+00> : vector<8x128xf32>
    %36 = tpu.matmul %34, %35, %cst_24 {dimension_numbers = #tpu.dot_dimension_numbers<[1], [0], [0], [1], [0, 0, 1, 1], [], []>} : vector<8x512xbf16>, vector<512x128xbf16>, vector<8x128xf32> -> vector<8x128xf32>
    %c0_25 = arith.constant 0 : index
    %c0_26 = arith.constant 0 : index
    %37 = vector.load %arg11[%c0_25, %c0_26] : memref<1x128xf32, #tpu.memory_space<vmem>>, vector<1x128xf32>
    %38 = vector.broadcast %37 : vector<1x128xf32> to vector<8x128xf32>
    %39 = arith.addf %36, %38 : vector<8x128xf32>
    %c0_27 = arith.constant 0 : index
    %c0_28 = arith.constant 0 : index
    %40 = vector.load %arg12[%c0_27, %c0_28] : memref<8x128xf32, #tpu.memory_space<vmem>>, vector<8x128xf32>
    tpu.vector_store %arg12[%c0_27, %c0_28], %39 {strides = array<i32>} : memref<8x128xf32, #tpu.memory_space<vmem>>, vector<8x128xf32>,
    return
  }
  func.func @transform_0(%arg0: i32) -> (i32, i32) {
    %c0_i32 = arith.constant 0 : i32
    %c0_i32_0 = arith.constant 0 : i32
    return %arg0, %c0_i32 : i32, i32
  }
  func.func @transform_1(%arg0: i32) -> (i32, i32) {
    %c0_i32 = arith.constant 0 : i32
    %c0_i32_0 = arith.constant 0 : i32
    %c0_i32_1 = arith.constant 0 : i32
    return %c0_i32, %c0_i32_0 : i32, i32
  }
  func.func @transform_2(%arg0: i32) -> (i32, i32) {
    %c0_i32 = arith.constant 0 : i32
    %c0_i32_0 = arith.constant 0 : i32
    %c0_i32_1 = arith.constant 0 : i32
    return %c0_i32, %c0_i32_0 : i32, i32
  }
  func.func @transform_3(%arg0: i32) -> (i32, i32) {
    %c0_i32 = arith.constant 0 : i32
    %c0_i32_0 = arith.constant 0 : i32
    %c0_i32_1 = arith.constant 0 : i32
    return %c0_i32, %c0_i32_0 : i32, i32
  }
  func.func @transform_4(%arg0: i32) -> (i32, i32) {
    %c0_i32 = arith.constant 0 : i32
    %c0_i32_0 = arith.constant 0 : i32
    %c0_i32_1 = arith.constant 0 : i32
    return %c0_i32, %c0_i32_0 : i32, i32
  }
  func.func @transform_5(%arg0: i32) -> (i32, i32) {
    %c0_i32 = arith.constant 0 : i32
    %c0_i32_0 = arith.constant 0 : i32
    %c0_i32_1 = arith.constant 0 : i32
    return %c0_i32, %c0_i32_0 : i32, i32
  }
  func.func @transform_6(%arg0: i32) -> (i32, i32) {
    %c0_i32 = arith.constant 0 : i32
    %c0_i32_0 = arith.constant 0 : i32
    %c0_i32_1 = arith.constant 0 : i32
    return %c0_i32, %c0_i32_0 : i32, i32
  }
  func.func @transform_7(%arg0: i32) -> (i32, i32) {
    %c0_i32 = arith.constant 0 : i32
    %c0_i32_0 = arith.constant 0 : i32
    %c0_i32_1 = arith.constant 0 : i32
    return %c0_i32, %c0_i32_0 : i32, i32
  }
  func.func @transform_8(%arg0: i32) -> (i32, i32) {
    %c0_i32 = arith.constant 0 : i32
    %c0_i32_0 = arith.constant 0 : i32
    %c0_i32_1 = arith.constant 0 : i32
    return %c0_i32, %c0_i32_0 : i32, i32
  }
  func.func @transform_9(%arg0: i32) -> (i32, i32) {
    %c0_i32 = arith.constant 0 : i32
    %c0_i32_0 = arith.constant 0 : i32
    %c0_i32_1 = arith.constant 0 : i32
    return %c0_i32, %c0_i32_0 : i32, i32
  }
  func.func @transform_10(%arg0: i32) -> (i32, i32) {
    %c0_i32 = arith.constant 0 : i32
    %c0_i32_0 = arith.constant 0 : i32
    %c0_i32_1 = arith.constant 0 : i32
    return %c0_i32, %c0_i32_0 : i32, i32
  }
  func.func @transform_11(%arg0: i32) -> (i32, i32) {
    %c0_i32 = arith.constant 0 : i32
    %c0_i32_0 = arith.constant 0 : i32
    return %arg0, %c0_i32 : i32, i32
  }
}

</mosaic_0001>

<bundles_post_ra>
// kernel: joint_pos_predictor_forward.1
= control target key start
LH: loop header
LB: loop body
LE: loop exit
PB: predicated region body
PF: predicated region fallthrough
CT: control target
= control target key end

     0   :  { %16 = vsyncpa [#allocation3], 0  ;;  %s1843_s0 = inlined_call_operand.vmem [shape: bf16[8,16], index: 0, kind: input, shape index: {}]   ;;  %s1844_s1 = inlined_call_operand.vmem [shape: bf16[16,512], index: 1, kind: input, shape index: {}]   ;;  %s1845_s2 = inlined_call_operand.hbm [shape: f32[1,512], index: 2, kind: input, shape index: {}]   ;;  %s1846_s3 = inlined_call_operand.hbm [shape: s8[512,512], index: 3, kind: input, shape index: {}]   ;;  %s1847_s4 = inlined_call_operand.hbm [shape: f32[1,512], index: 4, kind: input, shape index: {}]   ;;  %s1848_s5 = inlined_call_operand.vmem [shape: f32[1,512], index: 5, kind: input, shape index: {}]   ;;  %s1849_s6 = inlined_call_operand.hbm [shape: s8[512,512], index: 6, kind: input, shape index: {}]   ;;  %s1850_s7 = inlined_call_operand.vmem [shape: f32[1,512], index: 7, kind: input, shape index: {}]   ;;  %s1851_s8 = inlined_call_operand.vmem [shape: f32[1,512], index: 8, kind: input, shape index: {}]   ;;  %s1852_s9 = inlined_call_operand.hbm [shape: bf16[512,128], index: 9, kind: input, shape index: {}]   ;;  %s1853_s10 = inlined_call_operand.vmem [shape: f32[1,128], index: 10, kind: input, shape index: {}]   ;;  %s1854_s11 = inlined_call_operand.vmem [shape: f32[8,128], index: 11, kind: output, shape index: {}]  }
   0x1   :  { %17 = vsyncpa [#allocation5], 0 }
   0x2   :  { %18 = vsyncpa [#allocation8], 0  ;;  %s1664_s17 = smov [#allocation4]  }
   0x3   :  { %s38_s18 = sshll.u32 %s1664_s17, 4  ;;  %s39_s18 = int_to_ptr.vmem [resolvable:$true] %s38_s18 }
   0x4   :  { %s1566_s19 = scalar_lea.vmem %s39_s18, 8192  ;;  %p1571_p1 = scmp.lt.s32.totalorder %s39_s18, %s39_s18 }
   0x5   :  { %p1567_p0 = scmp.ne.s32.totalorder %s39_s18, %s1566_s19  ;;  %p1572_p2 = scmp.lt.s32.totalorder %s1566_s19, %s1566_s19 }
   0x7   :  { %p1573_p3 = por %p1572_p2, %p1571_p1 }
   0x9   :  { %p1574_p4 = pnand %p1573_p3, %p1567_p0 }
   0xb   :  { %1577 = shalt.err (!%p1574_p4)
}
   0xc   :  { %s1665_s20 = smov 512   ;;  %s1666_s21 = smov 32  }
   0xd   :  { %44 = dma.hbm_to_vmem [thread:$0]  %s1846_s3, 8192, %s39_s18, [#allocation5], %s1665_s20, %s1665_s20, %s1666_s21  }
   0xe   :  { %s1667_s24 = smov [#allocation7]   ;;  %s1668_s26 = smov [#allocation2]  }
   0xf   :  { %s62_s25 = sshll.u32 %s1667_s24, 4  ;;  %s29_s27 = sshll.u32 %s1668_s26, 4  ;;  %s63_s25 = int_to_ptr.vmem [resolvable:$true] %s62_s25  ;;  %s30_s27 = int_to_ptr.vmem [resolvable:$true] %s29_s27 }
  0x10   :  { %s1586_s28 = scalar_lea.vmem %s63_s25, 8192  ;;  %p1591_p6 = scmp.lt.s32.totalorder %s63_s25, %s63_s25 }
  0x11   :  { %p1587_p5 = scmp.ne.s32.totalorder %s63_s25, %s1586_s28  ;;  %p1592_p7 = scmp.lt.s32.totalorder %s1586_s28, %s1586_s28 }
  0x13   :  { %p1593_p8 = por %p1592_p7, %p1591_p6 }
  0x15   :  { %p1594_p9 = pnand %p1593_p8, %p1587_p5 }
  0x17   :  { %1597 = shalt.err (!%p1594_p9)
}
  0x18   :  { %68 = dma.hbm_to_vmem [thread:$0]  %s1849_s6, 8192, %s63_s25, [#allocation8], %s1665_s20, %s1665_s20, %s1666_s21  }
  0x19   :  { %s1606_s12 = scalar_lea.vmem %s30_s27, 64  ;;  %p1611_p11 = scmp.lt.s32.totalorder %s30_s27, %s30_s27 }
  0x1a   :  { %p1607_p10 = scmp.ne.s32.totalorder %s30_s27, %s1606_s12  ;;  %p1612_p12 = scmp.lt.s32.totalorder %s1606_s12, %s1606_s12 }
  0x1c   :  { %p1613_p13 = por %p1612_p12, %p1611_p11 }
  0x1e   :  { %p1614_p0 = pnand %p1613_p13, %p1607_p10 }
  0x20   :  { %1617 = shalt.err (!%p1614_p0)
}
  0x21   :  { %32 = dma.hbm_to_vmem [thread:$0]  %s1845_s2, 64, %s30_s27, [#allocation3]  }
  0x22   :  { %s1669_s14 = smov [#allocation6]   ;;  %s1670_s16 = smov [#allocation9]  }
  0x23   :  { %s51_s15 = sshll.u32 %s1669_s14, 4  ;;  %s78_s17 = sshll.u32 %s1670_s16, 4  ;;  %s52_s15 = int_to_ptr.vmem [resolvable:$true] %s51_s15  ;;  %s79_s17 = int_to_ptr.vmem [resolvable:$true] %s78_s17 }
  0x24   :  { %s1626_s18 = scalar_lea.vmem %s52_s15, 64  ;;  %p1631_p2 = scmp.lt.s32.totalorder %s52_s15, %s52_s15 }
  0x25   :  { %p1627_p1 = scmp.ne.s32.totalorder %s52_s15, %s1626_s18  ;;  %p1632_p3 = scmp.lt.s32.totalorder %s1626_s18, %s1626_s18 }
  0x27   :  { %p1633_p4 = por %p1632_p3, %p1631_p2 }
  0x29   :  { %p1634_p5 = pnand %p1633_p4, %p1627_p1 }
  0x2b   :  { %1637 = shalt.err (!%p1634_p5)
}
  0x2c   :  { %54 = dma.hbm_to_vmem [thread:$0]  %s1847_s4, 64, %s52_s15, [#allocation5]  }
  0x2d   :  { %s1646_s20 = scalar_lea.vmem %s79_s17, 4096  ;;  %p1651_p7 = scmp.lt.s32.totalorder %s79_s17, %s79_s17 }
  0x2e   :  { %p1647_p6 = scmp.ne.s32.totalorder %s79_s17, %s1646_s20  ;;  %p1652_p8 = scmp.lt.s32.totalorder %s1646_s20, %s1646_s20 }
  0x30   :  { %p1653_p9 = por %p1652_p8, %p1651_p7 }
  0x32   :  { %p1654_p10 = pnand %p1653_p9, %p1647_p6 }
  0x34   :  { %1657 = shalt.err (!%p1654_p10)
}
  0x35   :  { %s1671_s2 = smov 64   ;;  %s1672_s21 = smov 4  }
  0x36   :  { %84 = dma.hbm_to_vmem [thread:$0]  %s1852_s9, 4096, %s79_s17, [#allocation8], %s1671_s2, %s1671_s2, %s1672_s21  }
  0x37   :  { %1658 = dma.done.wait [#allocation3], 64  }
  0x38   :  { %1659 = vsyncadd [#allocation3], 4294967232 }
  0x39   :  { %1660 = dma.done.wait [#allocation5], 8256  }
  0x3a   :  { %1661 = vsyncadd [#allocation5], 4294959040 }
  0x3b   :  { %1662 = dma.done.wait [#allocation8], 12288  }
  0x3c   :  { %1663 = vsyncadd [#allocation8], 4294955008  ;;  %v1673_v0 = vmov 0   ;;  %v1520_v1 = vld [vmem:[%s1844_s1 + $0x4] ss:$16 sps:$4 sm:$0xff]   ;;  %v253_v5 = vld [vmem:[#allocation4 + $0x68] sm:$0xff] }
  0x3d   :  { %186 = vmatprep.mubr.bf16.mxu0 %v1673_v0  ;;  %227 = vmatprep.mubr.bf16.mxu1 %v1673_v0  ;;  %v1522_v2 = vld [vmem:[%s1844_s1 + $0xc] ss:$16 sps:$4 sm:$0xff]   ;;  %v1524_v3 = vld [vmem:[%s1844_s1] ss:$16 sps:$4 sm:$0xff]   ;;  %v1525_v4 = vld [vmem:[%s1844_s1 + $0x8] ss:$16 sps:$4 sm:$0xff]   ;;  %v333_v9 = vunpack.c.h.s8.bf16 %v253_v5  ;;  %v329_v14 = vunpack.c.l.s8.bf16 %v253_v5 }
  0x3e   :  { %168 = vmatprep.subr.bf16.mxu0 %v1520_v1  ;;  %209 = vmatprep.subr.bf16.mxu1 %v1522_v2  ;;  %v285_v6 = vld [vmem:[#allocation4 + $0x168] sm:$0xff]  ;;  %v252_v7 = vld [vmem:[#allocation4 + $0x60] sm:$0xff]  ;;  %v103_v8 = vld [vmem:[%s1843_s0] sm:$0xf]  ;;  %vm150_vm0 = vcmask 130048  }
  0x3f   :  { %169 = vmatpush1.bf16.msra.mxu0 %v1524_v3  ;;  %210 = vmatpush1.bf16.msra.mxu1 %v1525_v4  ;;  %v397_v10 = vunpack.c.h.s8.bf16 %v285_v6  ;;  %v332_v11 = vunpack.c.h.s8.bf16 %v252_v7  ;;  %v284_v12 = vld [vmem:[#allocation4 + $0x160] sm:$0xff]  ;;  %v393_v15 = vunpack.c.l.s8.bf16 %v285_v6  ;;  %v249_v16 = vld [vmem:[#allocation4 + $0x48] sm:$0xff]  ;;  %v328_v18 = vunpack.c.l.s8.bf16 %v252_v7 }
  0x40   :  { %v396_v13 = vunpack.c.h.s8.bf16 %v284_v12  ;;  %436 = vmatprep.subr.bf16.mxu0 %v333_v9  ;;  %v281_v17 = vld [vmem:[#allocation4 + $0x148] sm:$0xff]  ;;  %v392_v19 = vunpack.c.l.s8.bf16 %v284_v12  ;;  %v325_v20 = vunpack.c.h.s8.bf16 %v249_v16  ;;  %v248_v22 = vld [vmem:[#allocation4 + $0x40] sm:$0xff]  ;;  %v321_v28 = vunpack.c.l.s8.bf16 %v249_v16 }
  0x41   :  { %477 = vmatprep.subr.bf16.mxu1 %v397_v10  ;;  %v389_v21 = vunpack.c.h.s8.bf16 %v281_v17  ;;  %v280_v23 = vld [vmem:[#allocation4 + $0x140] sm:$0xff]  ;;  %v324_v24 = vunpack.c.h.s8.bf16 %v248_v22  ;;  %v245_v26 = vld [vmem:[#allocation4 + $0x28] sm:$0xff]  ;;  %v385_v29 = vunpack.c.l.s8.bf16 %v281_v17  ;;  %v320_v32 = vunpack.c.l.s8.bf16 %v248_v22 }
  0x42   :  { %1431 = vmatmul.mubr.msk.bf16.vlgmr.msra.gmra.mxu0 %vm150_vm0, %v103_v8  ;;  %1432 = vmatmul.mubr.msk.bf16.vlgmr.msra.gmra.mxu1 %vm150_vm0, %v103_v8  ;;  %v388_v25 = vunpack.c.h.s8.bf16 %v280_v23  ;;  %v277_v27 = vld [vmem:[#allocation4 + $0x128] sm:$0xff]  ;;  %v244_v30 = vld [vmem:[#allocation4 + $0x20] sm:$0xff]  ;;  %v384_v33 = vunpack.c.l.s8.bf16 %v280_v23  ;;  %v317_v34 = vunpack.c.h.s8.bf16 %v245_v26  ;;  %v313_v40 = vunpack.c.l.s8.bf16 %v245_v26 }
  0x43   :  { %437 = vmatpush1.bf16.msra.mxu0 %v332_v11  ;;  %478 = vmatpush1.bf16.msra.mxu1 %v396_v13  ;;  %v276_v31 = vld [vmem:[#allocation4 + $0x120] sm:$0xff]  ;;  %v381_v35 = vunpack.c.h.s8.bf16 %v277_v27  ;;  %v316_v36 = vunpack.c.h.s8.bf16 %v244_v30  ;;  %v241_v38 = vld [vmem:[#allocation4 + $0x8] sm:$0xff]  ;;  %v377_v41 = vunpack.c.l.s8.bf16 %v277_v27  ;;  %v312_v44 = vunpack.c.l.s8.bf16 %v244_v30 }
  0x44   :  { %438 = vmatprep.subr.bf16.mxu0 %v329_v14  ;;  %479 = vmatprep.subr.bf16.mxu1 %v393_v15  ;;  %v380_v37 = vunpack.c.h.s8.bf16 %v276_v31  ;;  %v273_v39 = vld [vmem:[#allocation4 + $0x108] sm:$0xff]  ;;  %v240_v42 = vld [vmem:[#allocation4] sm:$0xff]  ;;  %v376_v45 = vunpack.c.l.s8.bf16 %v276_v31  ;;  %v309_v46 = vunpack.c.h.s8.bf16 %v241_v38  ;;  %v305_v52 = vunpack.c.l.s8.bf16 %v241_v38  ;;  %v255_v38 = vld [vmem:[#allocation4 + $0x78] sm:$0xff] }
  0x45   :  { %v272_v43 = vld [vmem:[#allocation4 + $0x100] sm:$0xff]  ;;  %v373_v47 = vunpack.c.h.s8.bf16 %v273_v39  ;;  %v308_v48 = vunpack.c.h.s8.bf16 %v240_v42  ;;  %v269_v50 = vld [vmem:[#allocation4 + $0xe8] sm:$0xff]  ;;  %v369_v53 = vunpack.c.l.s8.bf16 %v273_v39  ;;  %v304_v56 = vunpack.c.l.s8.bf16 %v240_v42  ;;  %v287_v39 = vld [vmem:[#allocation4 + $0x178] sm:$0xff] }
  0x46   :  { %v372_v49 = vunpack.c.h.s8.bf16 %v272_v43  ;;  %v301_v51 = vld [vmem:[#allocation4 + $0x1e8] sm:$0xff]  ;;  %v268_v54 = vld [vmem:[#allocation4 + $0xe0] sm:$0xff]  ;;  %v368_v57 = vunpack.c.l.s8.bf16 %v272_v43  ;;  %v365_v58 = vunpack.c.h.s8.bf16 %v269_v50  ;;  %v361_v62 = vunpack.c.l.s8.bf16 %v269_v50 }
  0x47   :  { %439 = vmatpush1.bf16.msra.mxu0 %v328_v18  ;;  %480 = vmatpush1.bf16.msra.mxu1 %v392_v19  ;;  %v300_v55 = vld [vmem:[#allocation4 + $0x1e0] sm:$0xff]  ;;  %v429_v59 = vunpack.c.h.s8.bf16 %v301_v51  ;;  %v364_v60 = vunpack.c.h.s8.bf16 %v268_v54  ;;  %v425_v63 = vunpack.c.l.s8.bf16 %v301_v51  ;;  %v265_v0 = vld [vmem:[#allocation4 + $0xc8] sm:$0xff]  ;;  %v360_v2 = vunpack.c.l.s8.bf16 %v268_v54 }
  0x48   :  { %440 = vmatprep.subr.bf16.mxu0 %v325_v20  ;;  %481 = vmatprep.subr.bf16.mxu1 %v389_v21  ;;  %v428_v61 = vunpack.c.h.s8.bf16 %v300_v55  ;;  %v297_v1 = vld [vmem:[#allocation4 + $0x1c8] sm:$0xff]  ;;  %v424_v3 = vunpack.c.l.s8.bf16 %v300_v55  ;;  %v357_v4 = vunpack.c.h.s8.bf16 %v265_v0  ;;  %v264_v6 = vld [vmem:[#allocation4 + $0xc0] sm:$0xff]  ;;  %v353_v10 = vunpack.c.l.s8.bf16 %v265_v0 }
  0x49   :  { %v421_v5 = vunpack.c.h.s8.bf16 %v297_v1  ;;  %v296_v7 = vld [vmem:[#allocation4 + $0x1c0] sm:$0xff]  ;;  %v356_v8 = vunpack.c.h.s8.bf16 %v264_v6  ;;  %v417_v11 = vunpack.c.l.s8.bf16 %v297_v1  ;;  %v261_v12 = vld [vmem:[#allocation4 + $0xa8] sm:$0xff]  ;;  %v352_v14 = vunpack.c.l.s8.bf16 %v264_v6  ;;  %v254_v1 = vld [vmem:[#allocation4 + $0x70] sm:$0xff] }
  0x4a   :  { %v420_v9 = vunpack.c.h.s8.bf16 %v296_v7  ;;  %v293_v13 = vld [vmem:[#allocation4 + $0x1a8] sm:$0xff]  ;;  %v416_v15 = vunpack.c.l.s8.bf16 %v296_v7  ;;  %v349_v16 = vunpack.c.h.s8.bf16 %v261_v12  ;;  %v260_v18 = vld [vmem:[#allocation4 + $0xa0] sm:$0xff]  ;;  %v345_v22 = vunpack.c.l.s8.bf16 %v261_v12 }
  0x4b   :  { %441 = vmatpush1.bf16.msra.mxu0 %v324_v24  ;;  %482 = vmatpush1.bf16.msra.mxu1 %v388_v25  ;;  %v413_v17 = vunpack.c.h.s8.bf16 %v293_v13  ;;  %v292_v19 = vld [vmem:[#allocation4 + $0x1a0] sm:$0xff]  ;;  %v348_v20 = vunpack.c.h.s8.bf16 %v260_v18  ;;  %v409_v23 = vunpack.c.l.s8.bf16 %v293_v13  ;;  %v344_v24 = vunpack.c.l.s8.bf16 %v260_v18  ;;  %v257_v26 = vld [vmem:[#allocation4 + $0x88] sm:$0xff] }
  0x4c   :  { %442 = vmatprep.subr.bf16.mxu0 %v321_v28  ;;  %483 = vmatprep.subr.bf16.mxu1 %v385_v29  ;;  %v412_v21 = vunpack.c.h.s8.bf16 %v292_v19  ;;  %v408_v25 = vunpack.c.l.s8.bf16 %v292_v19  ;;  %v289_v27 = vld [vmem:[#allocation4 + $0x188] sm:$0xff]  ;;  %v341_v28 = vunpack.c.h.s8.bf16 %v257_v26  ;;  %v256_v30 = vld [vmem:[#allocation4 + $0x80] sm:$0xff]  ;;  %v110_v42 = vlaneseq }
  0x4d   :  { %v405_v29 = vunpack.c.h.s8.bf16 %v289_v27  ;;  %v288_v31 = vld [vmem:[#allocation4 + $0x180] sm:$0xff]  ;;  %v331_v13 = vunpack.c.l.s8.bf16 %v255_v38 }
  0x4e   :  { %v111_v43 = vshrl.u32 %v110_v42, 7 }
  0x4f   :  { %443 = vmatpush1.bf16.msra.mxu0 %v320_v32  ;;  %484 = vmatpush1.bf16.msra.mxu1 %v384_v33  ;;  %v340_v32 = vunpack.c.h.s8.bf16 %v256_v30  ;;  %v404_v33 = vunpack.c.h.s8.bf16 %v288_v31 }
  0x50   :  { %444 = vmatprep.subr.bf16.mxu0 %v317_v34  ;;  %485 = vmatprep.subr.bf16.mxu1 %v381_v35  ;;  %v337_v34 = vunpack.c.l.s8.bf16 %v257_v26  ;;  %v401_v35 = vunpack.c.l.s8.bf16 %v289_v27  ;;  %v247_v27 = vld [vmem:[#allocation4 + $0x38] sm:$0xff] }
  0x53   :  { %445 = vmatpush1.bf16.msra.mxu0 %v316_v36  ;;  %486 = vmatpush1.bf16.msra.mxu1 %v380_v37  ;;  %v336_v36 = vunpack.c.l.s8.bf16 %v256_v30  ;;  %v400_v37 = vunpack.c.l.s8.bf16 %v288_v31  ;;  %v319_v31 = vunpack.c.h.s8.bf16 %v247_v27 }
  0x54   :  { %446 = vmatprep.subr.bf16.mxu0 %v313_v40  ;;  %487 = vmatprep.subr.bf16.mxu1 %v377_v41  ;;  %v335_v40 = vunpack.c.h.s8.bf16 %v255_v38  ;;  %v399_v41 = vunpack.c.h.s8.bf16 %v287_v39 }
  0x57   :  { %447 = vmatpush1.bf16.msra.mxu0 %v312_v44  ;;  %488 = vmatpush1.bf16.msra.mxu1 %v376_v45  ;;  %v1764_v44 = vsub.s32 0, %v111_v43  ;;  %v1766_v45 = vsub.s32 2, %v111_v43 }
  0x58   :  { %448 = vmatprep.subr.bf16.mxu0 %v309_v46  ;;  %489 = vmatprep.subr.bf16.mxu1 %v373_v47  ;;  %v108_v46 = vld [vmem:[#allocation2] sm:$0xf]  ;;  %v1768_v47 = vsub.s32 1, %v111_v43 }
  0x59   :  { %v121_v50 = vrot.slane %v108_v46, %v1766_v45 }
  0x5a   :  { %v117_v51 = vrot.slane %v108_v46, %v1768_v47 }
  0x5b   :  { %449 = vmatpush1.bf16.msra.mxu0 %v308_v48  ;;  %490 = vmatpush1.bf16.msra.mxu1 %v372_v49  ;;  %v1770_v48 = vsub.s32 3, %v111_v43  ;;  %v113_v49 = vrot.slane %v108_v46, %v1764_v44 }
  0x5c   :  { %450 = vmatprep.subr.bf16.mxu0 %v305_v52  ;;  %491 = vmatprep.subr.bf16.mxu1 %v369_v53 }
  0x5d   :  { %v125_v52 = vrot.slane %v108_v46, %v1770_v48 }
  0x5f   :  { %451 = vmatpush1.bf16.msra.mxu0 %v304_v56  ;;  %492 = vmatpush1.bf16.msra.mxu1 %v368_v57 }
  0x60   :  { %452 = vmatprep.subr.bf16.mxu0 %v365_v58  ;;  %493 = vmatprep.subr.bf16.mxu1 %v429_v59 }
  0x63   :  { %453 = vmatpush2.bf16.msra.mxu0 %v364_v60  ;;  %494 = vmatpush2.bf16.msra.mxu1 %v428_v61 }
  0x64   :  { %454 = vmatprep.subr.bf16.mxu0 %v361_v62  ;;  %495 = vmatprep.subr.bf16.mxu1 %v425_v63 }
  0x67   :  { %455 = vmatpush2.bf16.msra.mxu0 %v360_v2  ;;  %496 = vmatpush2.bf16.msra.mxu1 %v424_v3  ;;  %v286_v2 = vld [vmem:[#allocation4 + $0x170] sm:$0xff] }
  0x68   :  { %456 = vmatprep.subr.bf16.mxu0 %v357_v4  ;;  %497 = vmatprep.subr.bf16.mxu1 %v421_v5  ;;  %v394_v18 = vunpack.c.l.s8.bf16 %v286_v2 }
  0x6b   :  { %457 = vmatpush2.bf16.msra.mxu0 %v356_v8  ;;  %498 = vmatpush2.bf16.msra.mxu1 %v420_v9  ;;  %v334_v9 = vunpack.c.h.s8.bf16 %v254_v1 }
  0x6c   :  { %458 = vmatprep.subr.bf16.mxu0 %v353_v10  ;;  %499 = vmatprep.subr.bf16.mxu1 %v417_v11  ;;  %v398_v10 = vunpack.c.h.s8.bf16 %v286_v2 }
  0x6f   :  { %459 = vmatpush2.bf16.msra.mxu0 %v352_v14  ;;  %500 = vmatpush2.bf16.msra.mxu1 %v416_v15  ;;  %v395_v14 = vunpack.c.l.s8.bf16 %v287_v39  ;;  %v251_v15 = vld [vmem:[#allocation4 + $0x58] sm:$0xff] }
  0x70   :  { %460 = vmatprep.subr.bf16.mxu0 %v349_v16  ;;  %501 = vmatprep.subr.bf16.mxu1 %v413_v17  ;;  %v283_v16 = vld [vmem:[#allocation4 + $0x158] sm:$0xff]  ;;  %v330_v17 = vunpack.c.l.s8.bf16 %v254_v1  ;;  %v327_v19 = vunpack.c.h.s8.bf16 %v251_v15 }
  0x71   :  { %v387_v26 = vunpack.c.l.s8.bf16 %v283_v16  ;;  %v243_v39 = vld [vmem:[#allocation4 + $0x18] sm:$0xff] }
  0x72   :  { %v311_v43 = vunpack.c.h.s8.bf16 %v243_v39 }
  0x73   :  { %461 = vmatpush2.bf16.msra.mxu0 %v348_v20  ;;  %502 = vmatpush2.bf16.msra.mxu1 %v412_v21  ;;  %v391_v20 = vunpack.c.h.s8.bf16 %v283_v16  ;;  %v250_v21 = vld [vmem:[#allocation4 + $0x50] sm:$0xff] }
  0x74   :  { %462 = vmatprep.subr.bf16.mxu0 %v345_v22  ;;  %503 = vmatprep.subr.bf16.mxu1 %v409_v23  ;;  %v282_v22 = vld [vmem:[#allocation4 + $0x150] sm:$0xff]  ;;  %v326_v23 = vunpack.c.h.s8.bf16 %v250_v21 }
  0x75   :  { %v386_v30 = vunpack.c.l.s8.bf16 %v282_v22 }
  0x77   :  { %463 = vmatpush2.bf16.msra.mxu0 %v344_v24  ;;  %504 = vmatpush2.bf16.msra.mxu1 %v408_v25  ;;  %v390_v24 = vunpack.c.h.s8.bf16 %v282_v22  ;;  %v323_v25 = vunpack.c.l.s8.bf16 %v251_v15 }
  0x78   :  { %464 = vmatprep.subr.bf16.mxu0 %v341_v28  ;;  %505 = vmatprep.subr.bf16.mxu1 %v405_v29  ;;  %v279_v28 = vld [vmem:[#allocation4 + $0x138] sm:$0xff]  ;;  %v322_v29 = vunpack.c.l.s8.bf16 %v250_v21 }
  0x79   :  { %v379_v38 = vunpack.c.l.s8.bf16 %v279_v28 }
  0x7b   :  { %465 = vmatpush2.bf16.msra.mxu0 %v340_v32  ;;  %506 = vmatpush2.bf16.msra.mxu1 %v404_v33  ;;  %v383_v32 = vunpack.c.h.s8.bf16 %v279_v28  ;;  %v246_v33 = vld [vmem:[#allocation4 + $0x30] sm:$0xff] }
  0x7c   :  { %466 = vmatprep.subr.bf16.mxu0 %v337_v34  ;;  %507 = vmatprep.subr.bf16.mxu1 %v401_v35  ;;  %v278_v34 = vld [vmem:[#allocation4 + $0x130] sm:$0xff]  ;;  %v318_v35 = vunpack.c.h.s8.bf16 %v246_v33 }
  0x7d   :  { %v378_v42 = vunpack.c.l.s8.bf16 %v278_v34 }
  0x7f   :  { %467 = vmatpush2.bf16.msra.mxu0 %v336_v36  ;;  %508 = vmatpush2.bf16.msra.mxu1 %v400_v37  ;;  %v382_v36 = vunpack.c.h.s8.bf16 %v278_v34  ;;  %v315_v37 = vunpack.c.l.s8.bf16 %v247_v27 }
  0x80   :  { %518 = vmatprep.subr.bf16.mxu0 %v335_v40  ;;  %559 = vmatprep.subr.bf16.mxu1 %v399_v41  ;;  %v275_v40 = vld [vmem:[#allocation4 + $0x118] sm:$0xff]  ;;  %v314_v41 = vunpack.c.l.s8.bf16 %v246_v33 }
  0x81   :  { %v375_v46 = vunpack.c.h.s8.bf16 %v275_v40 }
 0x102   :  { %v188_v53 = vpop.f32.mrf.mxu0  ;;  %v229_v54 = vpop.f32.mrf.mxu1 }
 0x103   :  { %v189_v55 = vadd.f32 %v188_v53, %v113_v49  ;;  %v230_v56 = vadd.f32 %v229_v54, %v121_v50  ;;  %v242_v49 = vld [vmem:[#allocation4 + $0x10] sm:$0xff]  ;;  %v307_v53 = vunpack.c.l.s8.bf16 %v243_v39  ;;  %v371_v54 = vunpack.c.l.s8.bf16 %v275_v40 }
 0x104   :  { %v190_v57 = vpop.f32.mrf.mxu0  ;;  %v231_v58 = vpop.f32.mrf.mxu1  ;;  %v274_v50 = vld [vmem:[#allocation4 + $0x110] sm:$0xff] }
 0x105   :  { %v191_v59 = vadd.f32 %v190_v57, %v117_v51  ;;  %v232_v60 = vadd.f32 %v231_v58, %v125_v52  ;;  %v236_v61 = vmax.f32 %v189_v55, 0.0  ;;  %v238_v62 = vmax.f32 %v230_v56, 0.0  ;;  %v271_v55 = vld [vmem:[#allocation4 + $0xf8] sm:$0xff] }
 0x106   :  { %v192_v63 = vpop.f32.mrf.mxu0  ;;  %v233_v0 = vpop.f32.mrf.mxu1  ;;  %v310_v51 = vunpack.c.h.s8.bf16 %v242_v49  ;;  %v374_v52 = vunpack.c.h.s8.bf16 %v274_v50  ;;  %v303_v56 = vld [vmem:[#allocation4 + $0x1f8] sm:$0xff]  ;;  %v306_v57 = vunpack.c.l.s8.bf16 %v242_v49  ;;  %v370_v58 = vunpack.c.l.s8.bf16 %v274_v50  ;;  %v668_v49 = vld [vmem:[#allocation7 + $0x60] sm:$0xff] }
 0x107   :  { %v237_v3 = vmax.f32 %v191_v59, 0.0  ;;  %v239_v4 = vmax.f32 %v232_v60, 0.0  ;;  %v1776_v11 = vpack.c.bf16 %v236_v61, %v236_v61  ;;  %v1778_v12 = vpack.c.bf16 %v238_v62, %v238_v62  ;;  %v270_v61 = vld [vmem:[#allocation4 + $0xf0] sm:$0xff] }
 0x108   :  { %v193_v5 = vpop.f32.mrf.mxu0  ;;  %v234_v6 = vpop.f32.mrf.mxu1  ;;  %v367_v59 = vunpack.c.h.s8.bf16 %v271_v55  ;;  %v431_v60 = vunpack.c.h.s8.bf16 %v303_v56  ;;  %v302_v62 = vld [vmem:[#allocation4 + $0x1f0] sm:$0xff]  ;;  %v366_v63 = vunpack.c.h.s8.bf16 %v270_v61  ;;  %v363_v1 = vunpack.c.l.s8.bf16 %v271_v55  ;;  %v664_v55 = vld [vmem:[#allocation7 + $0x40] sm:$0xff] }
 0x109   :  { %v433_v7 = vpack.c.bf16 %v237_v3, %v237_v3  ;;  %v435_v8 = vpack.c.bf16 %v239_v4, %v239_v4  ;;  %v430_v0 = vunpack.c.h.s8.bf16 %v302_v62  ;;  %v427_v2 = vunpack.c.l.s8.bf16 %v303_v56  ;;  %v267_v3 = vld [vmem:[#allocation4 + $0xd8] sm:$0xff] }
 0x10a   :  { %v299_v4 = vld [vmem:[#allocation4 + $0x1d8] sm:$0xff]  ;;  %v362_v5 = vunpack.c.l.s8.bf16 %v270_v61  ;;  %v426_v6 = vunpack.c.l.s8.bf16 %v302_v62  ;;  %v355_v15 = vunpack.c.l.s8.bf16 %v267_v3  ;;  %v748_v50 = vunpack.c.h.s8.bf16 %v668_v49  ;;  %v660_v62 = vld [vmem:[#allocation7 + $0x20] sm:$0xff] }
 0x10b   :  { %468 = vmatprep.mubr.bf16.mxu0 %v433_v7  ;;  %509 = vmatprep.mubr.bf16.mxu1 %v435_v8  ;;  %v419_v16 = vunpack.c.l.s8.bf16 %v299_v4  ;;  %v740_v56 = vunpack.c.h.s8.bf16 %v664_v55 }
 0x10c   :  { %469 = vmatmul.mubr.bf16.vlgmr.msra.gmra.mxu0 %v1776_v11  ;;  %510 = vmatmul.mubr.bf16.vlgmr.msra.gmra.mxu1 %v1778_v12 }
 0x10d   :  { %519 = vmatpush1.bf16.msra.mxu0 %v334_v9  ;;  %560 = vmatpush1.bf16.msra.mxu1 %v398_v10  ;;  %v266_v9 = vld [vmem:[#allocation4 + $0xd0] sm:$0xff] }
 0x10e   :  { %550 = vmatprep.mubr.bf16.mxu0 %v433_v7  ;;  %591 = vmatprep.mubr.bf16.mxu1 %v435_v8  ;;  %v359_v7 = vunpack.c.h.s8.bf16 %v267_v3  ;;  %v423_v8 = vunpack.c.h.s8.bf16 %v299_v4  ;;  %v298_v10 = vld [vmem:[#allocation4 + $0x1d0] sm:$0xff] }
 0x10f   :  { %520 = vmatprep.subr.bf16.mxu0 %v331_v13  ;;  %561 = vmatprep.subr.bf16.mxu1 %v395_v14  ;;  %v358_v13 = vunpack.c.h.s8.bf16 %v266_v9  ;;  %v422_v14 = vunpack.c.h.s8.bf16 %v298_v10 }
 0x111   :  { %521 = vmatpush1.bf16.msra.mxu0 %v330_v17  ;;  %562 = vmatpush1.bf16.msra.mxu1 %v394_v18  ;;  %v263_v17 = vld [vmem:[#allocation4 + $0xb8] sm:$0xff] }
 0x112   :  { %522 = vmatprep.subr.bf16.mxu0 %v327_v19  ;;  %563 = vmatprep.subr.bf16.mxu1 %v391_v20  ;;  %v295_v18 = vld [vmem:[#allocation4 + $0x1b8] sm:$0xff]  ;;  %v354_v19 = vunpack.c.l.s8.bf16 %v266_v9  ;;  %v418_v20 = vunpack.c.l.s8.bf16 %v298_v10  ;;  %v351_v21 = vunpack.c.h.s8.bf16 %v263_v17  ;;  %v347_v27 = vunpack.c.l.s8.bf16 %v263_v17  ;;  %v696_v10 = vld [vmem:[#allocation7 + $0x140] sm:$0xff] }
 0x113   :  { %v415_v22 = vunpack.c.h.s8.bf16 %v295_v18  ;;  %v411_v28 = vunpack.c.l.s8.bf16 %v295_v18  ;;  %v800_v18 = vunpack.c.l.s8.bf16 %v696_v10 }
 0x115   :  { %523 = vmatpush1.bf16.msra.mxu0 %v326_v23  ;;  %564 = vmatpush1.bf16.msra.mxu1 %v390_v24  ;;  %v262_v23 = vld [vmem:[#allocation4 + $0xb0] sm:$0xff] }
 0x116   :  { %524 = vmatprep.subr.bf16.mxu0 %v323_v25  ;;  %565 = vmatprep.subr.bf16.mxu1 %v387_v26  ;;  %v294_v24 = vld [vmem:[#allocation4 + $0x1b0] sm:$0xff]  ;;  %v350_v25 = vunpack.c.h.s8.bf16 %v262_v23 }
 0x117   :  { %v414_v26 = vunpack.c.h.s8.bf16 %v294_v24 }
 0x119   :  { %525 = vmatpush1.bf16.msra.mxu0 %v322_v29  ;;  %566 = vmatpush1.bf16.msra.mxu1 %v386_v30  ;;  %v259_v29 = vld [vmem:[#allocation4 + $0x98] sm:$0xff] }
 0x11a   :  { %526 = vmatprep.subr.bf16.mxu0 %v319_v31  ;;  %567 = vmatprep.subr.bf16.mxu1 %v383_v32  ;;  %v291_v30 = vld [vmem:[#allocation4 + $0x198] sm:$0xff]  ;;  %v346_v31 = vunpack.c.l.s8.bf16 %v262_v23  ;;  %v410_v32 = vunpack.c.l.s8.bf16 %v294_v24  ;;  %v343_v33 = vunpack.c.h.s8.bf16 %v259_v29  ;;  %v339_v39 = vunpack.c.l.s8.bf16 %v259_v29  ;;  %v692_v24 = vld [vmem:[#allocation7 + $0x120] sm:$0xff] }
 0x11b   :  { %v407_v34 = vunpack.c.h.s8.bf16 %v291_v30  ;;  %v403_v40 = vunpack.c.l.s8.bf16 %v291_v30  ;;  %v792_v30 = vunpack.c.l.s8.bf16 %v692_v24 }
 0x11d   :  { %527 = vmatpush1.bf16.msra.mxu0 %v318_v35  ;;  %568 = vmatpush1.bf16.msra.mxu1 %v382_v36  ;;  %v258_v35 = vld [vmem:[#allocation4 + $0x90] sm:$0xff] }
 0x11e   :  { %528 = vmatprep.subr.bf16.mxu0 %v315_v37  ;;  %569 = vmatprep.subr.bf16.mxu1 %v379_v38  ;;  %v290_v36 = vld [vmem:[#allocation4 + $0x190] sm:$0xff]  ;;  %v342_v37 = vunpack.c.h.s8.bf16 %v258_v35 }
 0x11f   :  { %v406_v38 = vunpack.c.h.s8.bf16 %v290_v36 }
 0x121   :  { %529 = vmatpush1.bf16.msra.mxu0 %v314_v41  ;;  %570 = vmatpush1.bf16.msra.mxu1 %v378_v42  ;;  %v669_v41 = vld [vmem:[#allocation7 + $0x68] sm:$0xff]  ;;  %v338_v42 = vunpack.c.l.s8.bf16 %v258_v35 }
 0x122   :  { %530 = vmatprep.subr.bf16.mxu0 %v311_v43  ;;  %571 = vmatprep.subr.bf16.mxu1 %v375_v46  ;;  %v402_v43 = vunpack.c.l.s8.bf16 %v290_v36  ;;  %v749_v46 = vunpack.c.h.s8.bf16 %v669_v41  ;;  %v688_v36 = vld [vmem:[#allocation7 + $0x100] sm:$0xff] }
 0x125   :  { %531 = vmatpush1.bf16.msra.mxu0 %v310_v51  ;;  %572 = vmatpush1.bf16.msra.mxu1 %v374_v52  ;;  %v745_v51 = vunpack.c.l.s8.bf16 %v669_v41  ;;  %v665_v52 = vld [vmem:[#allocation7 + $0x48] sm:$0xff] }
 0x126   :  { %532 = vmatprep.subr.bf16.mxu0 %v307_v53  ;;  %573 = vmatprep.subr.bf16.mxu1 %v371_v54  ;;  %v744_v53 = vunpack.c.l.s8.bf16 %v668_v49  ;;  %v741_v54 = vunpack.c.h.s8.bf16 %v665_v52  ;;  %v676_v49 = vld [vmem:[#allocation7 + $0xa0] sm:$0xff] }
 0x129   :  { %533 = vmatpush1.bf16.msra.mxu0 %v306_v57  ;;  %574 = vmatpush1.bf16.msra.mxu1 %v370_v58  ;;  %v737_v57 = vunpack.c.l.s8.bf16 %v665_v52  ;;  %v661_v58 = vld [vmem:[#allocation7 + $0x28] sm:$0xff]  ;;  %v716_v52 = vld [vmem:[#allocation7 + $0x1e0] sm:$0xff] }
 0x12a   :  { %534 = vmatprep.subr.bf16.mxu0 %v367_v59  ;;  %575 = vmatprep.subr.bf16.mxu1 %v431_v60  ;;  %v736_v59 = vunpack.c.l.s8.bf16 %v664_v55  ;;  %v701_v60 = vld [vmem:[#allocation7 + $0x168] sm:$0xff]  ;;  %v733_v61 = vunpack.c.h.s8.bf16 %v661_v58 }
 0x12b   :  { %v809_v3 = vunpack.c.l.s8.bf16 %v701_v60 }
 0x12d   :  { %535 = vmatpush2.bf16.msra.mxu0 %v366_v63  ;;  %576 = vmatpush2.bf16.msra.mxu1 %v430_v0  ;;  %v813_v63 = vunpack.c.h.s8.bf16 %v701_v60  ;;  %v732_v0 = vunpack.c.h.s8.bf16 %v660_v62 }
 0x12e   :  { %536 = vmatprep.subr.bf16.mxu0 %v363_v1  ;;  %577 = vmatprep.subr.bf16.mxu1 %v427_v2  ;;  %v729_v1 = vunpack.c.l.s8.bf16 %v661_v58  ;;  %v657_v2 = vld [vmem:[#allocation7 + $0x8] sm:$0xff]  ;;  %v840_v58 = vunpack.c.l.s8.bf16 %v716_v52 }
 0x131   :  { %537 = vmatpush2.bf16.msra.mxu0 %v362_v5  ;;  %578 = vmatpush2.bf16.msra.mxu1 %v426_v6  ;;  %v728_v5 = vunpack.c.l.s8.bf16 %v660_v62  ;;  %v725_v6 = vunpack.c.h.s8.bf16 %v657_v2  ;;  %v713_v62 = vld [vmem:[#allocation7 + $0x1c8] sm:$0xff] }
 0x132   :  { %538 = vmatprep.subr.bf16.mxu0 %v359_v7  ;;  %579 = vmatprep.subr.bf16.mxu1 %v423_v8  ;;  %v656_v7 = vld [vmem:[#allocation7] sm:$0xff]  ;;  %v697_v8 = vld [vmem:[#allocation7 + $0x148] sm:$0xff] }
 0x133   :  { %v805_v9 = vunpack.c.h.s8.bf16 %v697_v8  ;;  %v801_v17 = vunpack.c.l.s8.bf16 %v697_v8 }
 0x135   :  { %539 = vmatpush2.bf16.msra.mxu0 %v358_v13  ;;  %580 = vmatpush2.bf16.msra.mxu1 %v422_v14  ;;  %v804_v13 = vunpack.c.h.s8.bf16 %v696_v10  ;;  %v724_v14 = vunpack.c.h.s8.bf16 %v656_v7 }
 0x136   :  { %540 = vmatprep.subr.bf16.mxu0 %v355_v15  ;;  %581 = vmatprep.subr.bf16.mxu1 %v419_v16  ;;  %v721_v15 = vunpack.c.l.s8.bf16 %v657_v2  ;;  %v685_v16 = vld [vmem:[#allocation7 + $0xe8] sm:$0xff]  ;;  %v1784_v2 = vld [vmem:[#allocation7 + $0x78] sm:$0xff] }
 0x139   :  { %541 = vmatpush2.bf16.msra.mxu0 %v354_v19  ;;  %582 = vmatpush2.bf16.msra.mxu1 %v418_v20  ;;  %v720_v19 = vunpack.c.l.s8.bf16 %v656_v7  ;;  %v781_v20 = vunpack.c.h.s8.bf16 %v685_v16  ;;  %v709_v7 = vld [vmem:[#allocation7 + $0x1a8] sm:$0xff] }
 0x13a   :  { %542 = vmatprep.subr.bf16.mxu0 %v351_v21  ;;  %583 = vmatprep.subr.bf16.mxu1 %v415_v22  ;;  %v684_v21 = vld [vmem:[#allocation7 + $0xe0] sm:$0xff]  ;;  %v693_v22 = vld [vmem:[#allocation7 + $0x128] sm:$0xff]  ;;  %v829_v8 = vunpack.c.h.s8.bf16 %v709_v7 }
 0x13b   :  { %v797_v23 = vunpack.c.h.s8.bf16 %v693_v22  ;;  %v793_v29 = vunpack.c.l.s8.bf16 %v693_v22 }
 0x13d   :  { %543 = vmatpush2.bf16.msra.mxu0 %v350_v25  ;;  %584 = vmatpush2.bf16.msra.mxu1 %v414_v26  ;;  %v796_v25 = vunpack.c.h.s8.bf16 %v692_v24  ;;  %v780_v26 = vunpack.c.h.s8.bf16 %v684_v21  ;;  %v1795_v24 = vld [vmem:[%s1848_s5] sm:$0xf] }
 0x13e   :  { %544 = vmatprep.subr.bf16.mxu0 %v347_v27  ;;  %585 = vmatprep.subr.bf16.mxu1 %v411_v28  ;;  %v777_v27 = vunpack.c.l.s8.bf16 %v685_v16  ;;  %v681_v28 = vld [vmem:[#allocation7 + $0xc8] sm:$0xff] }
 0x141   :  { %545 = vmatpush2.bf16.msra.mxu0 %v346_v31  ;;  %586 = vmatpush2.bf16.msra.mxu1 %v410_v32  ;;  %v776_v31 = vunpack.c.l.s8.bf16 %v684_v21  ;;  %v773_v32 = vunpack.c.h.s8.bf16 %v681_v28  ;;  %v1787_v21 = vld [vmem:[#allocation7 + $0x178] sm:$0xff] }
 0x142   :  { %546 = vmatprep.subr.bf16.mxu0 %v343_v33  ;;  %587 = vmatprep.subr.bf16.mxu1 %v407_v34  ;;  %v680_v33 = vld [vmem:[#allocation7 + $0xc0] sm:$0xff]  ;;  %v689_v34 = vld [vmem:[#allocation7 + $0x108] sm:$0xff]  ;;  %v815_v22 = vunpack.c.h.s8.bf16 %v1787_v21 }
 0x143   :  { %v789_v35 = vunpack.c.h.s8.bf16 %v689_v34  ;;  %v785_v41 = vunpack.c.l.s8.bf16 %v689_v34 }
 0x145   :  { %547 = vmatpush2.bf16.msra.mxu0 %v342_v37  ;;  %588 = vmatpush2.bf16.msra.mxu1 %v406_v38  ;;  %v788_v37 = vunpack.c.h.s8.bf16 %v688_v36  ;;  %v772_v38 = vunpack.c.h.s8.bf16 %v680_v33 }
 0x146   :  { %548 = vmatprep.subr.bf16.mxu0 %v339_v39  ;;  %589 = vmatprep.subr.bf16.mxu1 %v403_v40  ;;  %v769_v39 = vunpack.c.l.s8.bf16 %v681_v28  ;;  %v677_v40 = vld [vmem:[#allocation7 + $0xa8] sm:$0xff] }
 0x147   :  { %v761_v55 = vunpack.c.l.s8.bf16 %v677_v40 }
 0x149   :  { %549 = vmatpush2.bf16.msra.mxu0 %v338_v42  ;;  %590 = vmatpush2.bf16.msra.mxu1 %v402_v43  ;;  %v784_v42 = vunpack.c.l.s8.bf16 %v688_v36  ;;  %v768_v43 = vunpack.c.l.s8.bf16 %v680_v33 }
 0x14a   :  { %852 = vmatprep.subr.bf16.mxu0 %v749_v46  ;;  %893 = vmatprep.subr.bf16.mxu1 %v813_v63  ;;  %v765_v46 = vunpack.c.h.s8.bf16 %v677_v40  ;;  %v837_v63 = vunpack.c.h.s8.bf16 %v713_v62 }
 0x14c   :  { %551 = vmatmul.mubr.bf16.vlgmr.msra.gmra.mxu0 %v1776_v11  ;;  %592 = vmatmul.mubr.bf16.vlgmr.msra.gmra.mxu1 %v1778_v12  ;;  %v700_v11 = vld [vmem:[#allocation7 + $0x160] sm:$0xff] }
 0x14d   :  { %853 = vmatpush1.bf16.msra.mxu0 %v748_v50  ;;  %v812_v12 = vunpack.c.h.s8.bf16 %v700_v11  ;;  %v808_v4 = vunpack.c.l.s8.bf16 %v700_v11  ;;  %v717_v50 = vld [vmem:[#allocation7 + $0x1e8] sm:$0xff]  ;;  %v712_v11 = vld [vmem:[#allocation7 + $0x1c0] sm:$0xff] }
 0x14e   :  { %854 = vmatprep.subr.bf16.mxu0 %v745_v51  ;;  %v845_v51 = vunpack.c.h.s8.bf16 %v717_v50 }
 0x14f   :  { %894 = vmatpush1.bf16.msra.mxu1 %v812_v12  ;;  %v836_v12 = vunpack.c.h.s8.bf16 %v712_v11 }
 0x150   :  { %895 = vmatprep.subr.bf16.mxu1 %v809_v3  ;;  %v833_v3 = vunpack.c.l.s8.bf16 %v713_v62 }
 0x151   :  { %855 = vmatpush1.bf16.msra.mxu0 %v744_v53  ;;  %v844_v53 = vunpack.c.h.s8.bf16 %v716_v52 }
 0x152   :  { %856 = vmatprep.subr.bf16.mxu0 %v741_v54  ;;  %v764_v54 = vunpack.c.h.s8.bf16 %v676_v49 }
 0x153   :  { %896 = vmatpush1.bf16.msra.mxu1 %v808_v4  ;;  %v832_v4 = vunpack.c.l.s8.bf16 %v712_v11 }
 0x154   :  { %897 = vmatprep.subr.bf16.mxu1 %v805_v9  ;;  %v708_v9 = vld [vmem:[#allocation7 + $0x1a0] sm:$0xff] }
 0x155   :  { %857 = vmatpush1.bf16.msra.mxu0 %v740_v56  ;;  %v673_v56 = vld [vmem:[#allocation7 + $0x88] sm:$0xff]  ;;  %v828_v10 = vunpack.c.h.s8.bf16 %v708_v9 }
 0x156   :  { %858 = vmatprep.subr.bf16.mxu0 %v737_v57  ;;  %v841_v57 = vunpack.c.l.s8.bf16 %v717_v50  ;;  %v757_v60 = vunpack.c.h.s8.bf16 %v673_v56 }
 0x157   :  { %898 = vmatpush1.bf16.msra.mxu1 %v804_v13  ;;  %v825_v13 = vunpack.c.l.s8.bf16 %v709_v7 }
 0x158   :  { %899 = vmatprep.subr.bf16.mxu1 %v801_v17  ;;  %v704_v17 = vld [vmem:[#allocation7 + $0x180] sm:$0xff] }
 0x159   :  { %859 = vmatpush1.bf16.msra.mxu0 %v736_v59  ;;  %v760_v59 = vunpack.c.l.s8.bf16 %v676_v49 }
 0x15a   :  { %860 = vmatprep.subr.bf16.mxu0 %v733_v61  ;;  %v672_v61 = vld [vmem:[#allocation7 + $0x80] sm:$0xff] }
 0x15b   :  { %900 = vmatpush1.bf16.msra.mxu1 %v800_v18  ;;  %v820_v18 = vunpack.c.h.s8.bf16 %v704_v17 }
 0x15c   :  { %901 = vmatprep.subr.bf16.mxu1 %v797_v23  ;;  %v1790_v23 = vld [vmem:[#allocation6] sm:$0xf] }
 0x15d   :  { %861 = vmatpush1.bf16.msra.mxu0 %v732_v0  ;;  %v756_v0 = vunpack.c.h.s8.bf16 %v672_v61 }
 0x15e   :  { %862 = vmatprep.subr.bf16.mxu0 %v729_v1  ;;  %v753_v1 = vunpack.c.l.s8.bf16 %v673_v56 }
 0x15f   :  { %902 = vmatpush1.bf16.msra.mxu1 %v796_v25  ;;  %v605_v25 = vrot.slane %v1790_v23, %v1764_v44 }
 0x160   :  { %903 = vmatprep.subr.bf16.mxu1 %v793_v29  ;;  %v631_v29 = vrot.slane %v1795_v24, %v1764_v44 }
 0x161   :  { %863 = vmatpush1.bf16.msra.mxu0 %v728_v5  ;;  %v752_v5 = vunpack.c.l.s8.bf16 %v672_v61 }
 0x162   :  { %864 = vmatprep.subr.bf16.mxu0 %v725_v6  ;;  %v751_v6 = vunpack.c.h.s8.bf16 %v1784_v2 }
 0x163   :  { %904 = vmatpush1.bf16.msra.mxu1 %v792_v30  ;;  %v609_v30 = vrot.slane %v1790_v23, %v1768_v47 }
 0x164   :  { %905 = vmatprep.subr.bf16.mxu1 %v789_v35  ;;  %v635_v35 = vrot.slane %v1795_v24, %v1768_v47 }
 0x165   :  { %865 = vmatpush1.bf16.msra.mxu0 %v724_v14  ;;  %v824_v14 = vunpack.c.l.s8.bf16 %v708_v9  ;;  %v686_v9 = vld [vmem:[#allocation7 + $0xf0] sm:$0xff] }
 0x166   :  { %866 = vmatprep.subr.bf16.mxu0 %v721_v15  ;;  %v705_v15 = vld [vmem:[#allocation7 + $0x188] sm:$0xff] }
 0x167   :  { %906 = vmatpush1.bf16.msra.mxu1 %v788_v37  ;;  %v821_v16 = vunpack.c.h.s8.bf16 %v705_v15 }
 0x168   :  { %907 = vmatprep.subr.bf16.mxu1 %v785_v41 }
 0x169   :  { %867 = vmatpush1.bf16.msra.mxu0 %v720_v19  ;;  %v817_v19 = vunpack.c.l.s8.bf16 %v705_v15  ;;  %v778_v15 = vunpack.c.l.s8.bf16 %v686_v9 }
 0x16a   :  { %868 = vmatprep.subr.bf16.mxu0 %v781_v20  ;;  %v816_v20 = vunpack.c.l.s8.bf16 %v704_v17  ;;  %v682_v17 = vld [vmem:[#allocation7 + $0xd0] sm:$0xff] }
 0x16b   :  { %908 = vmatpush1.bf16.msra.mxu1 %v784_v42 }
 0x16c   :  { %909 = vmatprep.subr.bf16.mxu1 %v845_v51 }
 0x16d   :  { %869 = vmatpush2.bf16.msra.mxu0 %v780_v26 }
 0x16e   :  { %870 = vmatprep.subr.bf16.mxu0 %v777_v27 }
 0x16f   :  { %910 = vmatpush2.bf16.msra.mxu1 %v844_v53  ;;  %v747_v53 = vunpack.c.l.s8.bf16 %v1784_v2 }
 0x170   :  { %911 = vmatprep.subr.bf16.mxu1 %v841_v57  ;;  %v666_v57 = vld [vmem:[#allocation7 + $0x50] sm:$0xff] }
 0x171   :  { %871 = vmatpush2.bf16.msra.mxu0 %v776_v31  ;;  %v738_v61 = vunpack.c.l.s8.bf16 %v666_v57 }
 0x172   :  { %872 = vmatprep.subr.bf16.mxu0 %v773_v32 }
 0x173   :  { %912 = vmatpush2.bf16.msra.mxu1 %v840_v58  ;;  %v742_v58 = vunpack.c.h.s8.bf16 %v666_v57 }
 0x174   :  { %913 = vmatprep.subr.bf16.mxu1 %v837_v63  ;;  %v662_v63 = vld [vmem:[#allocation7 + $0x30] sm:$0xff] }
 0x175   :  { %873 = vmatpush2.bf16.msra.mxu0 %v772_v38  ;;  %v734_v11 = vunpack.c.h.s8.bf16 %v662_v63 }
 0x176   :  { %874 = vmatprep.subr.bf16.mxu0 %v769_v39 }
 0x177   :  { %914 = vmatpush2.bf16.msra.mxu1 %v836_v12 }
 0x178   :  { %915 = vmatprep.subr.bf16.mxu1 %v833_v3  ;;  %v658_v3 = vld [vmem:[#allocation7 + $0x10] sm:$0xff] }
 0x179   :  { %875 = vmatpush2.bf16.msra.mxu0 %v768_v43  ;;  %v722_v7 = vunpack.c.l.s8.bf16 %v658_v3 }
 0x17a   :  { %876 = vmatprep.subr.bf16.mxu0 %v765_v46  ;;  %v670_v46 = vld [vmem:[#allocation7 + $0x70] sm:$0xff] }
 0x17b   :  { %916 = vmatpush2.bf16.msra.mxu1 %v832_v4  ;;  %v750_v51 = vunpack.c.h.s8.bf16 %v670_v46  ;;  %v726_v4 = vunpack.c.h.s8.bf16 %v658_v3 }
 0x17c   :  { %917 = vmatprep.subr.bf16.mxu1 %v829_v8 }
 0x17d   :  { %877 = vmatpush2.bf16.msra.mxu0 %v764_v54  ;;  %v667_v54 = vld [vmem:[#allocation7 + $0x58] sm:$0xff] }
 0x17e   :  { %878 = vmatprep.subr.bf16.mxu0 %v761_v55  ;;  %v746_v55 = vunpack.c.l.s8.bf16 %v670_v46  ;;  %v743_v56 = vunpack.c.h.s8.bf16 %v667_v54 }
 0x17f   :  { %918 = vmatpush2.bf16.msra.mxu1 %v828_v10  ;;  %v782_v10 = vunpack.c.h.s8.bf16 %v686_v9  ;;  %v694_v9 = vld [vmem:[#allocation7 + $0x130] sm:$0xff] }
 0x180   :  { %919 = vmatprep.subr.bf16.mxu1 %v825_v13 }
 0x181   :  { %879 = vmatpush2.bf16.msra.mxu0 %v760_v59  ;;  %v739_v59 = vunpack.c.l.s8.bf16 %v667_v54 }
 0x182   :  { %880 = vmatprep.subr.bf16.mxu0 %v757_v60  ;;  %v663_v60 = vld [vmem:[#allocation7 + $0x38] sm:$0xff] }
 0x183   :  { %920 = vmatpush2.bf16.msra.mxu1 %v824_v14  ;;  %v735_v62 = vunpack.c.h.s8.bf16 %v663_v60  ;;  %v731_v12 = vunpack.c.l.s8.bf16 %v663_v60  ;;  %v683_v14 = vld [vmem:[#allocation7 + $0xd8] sm:$0xff] }
 0x184   :  { %921 = vmatprep.subr.bf16.mxu1 %v821_v16  ;;  %v775_v16 = vunpack.c.h.s8.bf16 %v683_v14 }
 0x185   :  { %881 = vmatpush2.bf16.msra.mxu0 %v756_v0  ;;  %v659_v0 = vld [vmem:[#allocation7 + $0x18] sm:$0xff] }
 0x186   :  { %882 = vmatprep.subr.bf16.mxu0 %v753_v1  ;;  %v730_v1 = vunpack.c.l.s8.bf16 %v662_v63  ;;  %v727_v2 = vunpack.c.h.s8.bf16 %v659_v0  ;;  %v811_v63 = vunpack.c.l.s8.bf16 %v1787_v21  ;;  %v695_v21 = vld [vmem:[#allocation7 + $0x138] sm:$0xff] }
 0x187   :  { %922 = vmatpush2.bf16.msra.mxu1 %v820_v18  ;;  %v774_v18 = vunpack.c.h.s8.bf16 %v682_v17 }
 0x188   :  { %923 = vmatprep.subr.bf16.mxu1 %v817_v19  ;;  %v771_v19 = vunpack.c.l.s8.bf16 %v683_v14  ;;  %v1531_v14 = vld [vmem:[#allocation9 + $0x28] sm:$0xff]  }
 0x189   :  { %883 = vmatpush2.bf16.msra.mxu0 %v752_v5  ;;  %v723_v5 = vunpack.c.l.s8.bf16 %v659_v0 }
 0x18a   :  { %934 = vmatprep.subr.bf16.mxu0 %v751_v6  ;;  %v687_v6 = vld [vmem:[#allocation7 + $0xf8] sm:$0xff] }
 0x18b   :  { %924 = vmatpush2.bf16.msra.mxu1 %v816_v20  ;;  %v783_v8 = vunpack.c.h.s8.bf16 %v687_v6  ;;  %v779_v13 = vunpack.c.l.s8.bf16 %v687_v6  ;;  %v679_v20 = vld [vmem:[#allocation7 + $0xb8] sm:$0xff]  ;;  %v1528_v6 = vld [vmem:[#allocation9 + $0x70] sm:$0xff]  }
 0x18c   :  { %975 = vmatprep.subr.bf16.mxu1 %v815_v22  ;;  %v770_v22 = vunpack.c.l.s8.bf16 %v682_v17  ;;  %v691_v17 = vld [vmem:[#allocation7 + $0x118] sm:$0xff] }
 0x1cc   :  { %v470_v26 = vpop.f32.mrf.mxu0  ;;  %v511_v27 = vpop.f32.mrf.mxu1 }
 0x1cd   :  { %v512_v28 = vadd.f32 %v511_v27, %v470_v26  ;;  %v678_v26 = vld [vmem:[#allocation7 + $0xb0] sm:$0xff] }
 0x1ce   :  { %v472_v31 = vpop.f32.mrf.mxu0  ;;  %v513_v32 = vpop.f32.mrf.mxu1  ;;  %v766_v27 = vunpack.c.h.s8.bf16 %v678_v26 }
 0x1cf   :  { %v622_v33 = vmul.f32 %v605_v25, %v512_v28  ;;  %v514_v34 = vadd.f32 %v513_v32, %v472_v31  ;;  %v767_v25 = vunpack.c.h.s8.bf16 %v679_v20  ;;  %v763_v28 = vunpack.c.l.s8.bf16 %v679_v20 }
 0x1d0   :  { %v474_v36 = vpop.f32.mrf.mxu0  ;;  %v515_v37 = vpop.f32.mrf.mxu1  ;;  %v762_v31 = vunpack.c.l.s8.bf16 %v678_v26  ;;  %v791_v20 = vunpack.c.h.s8.bf16 %v691_v17 }
 0x1d1   :  { %v648_v38 = vadd.f32 %v631_v29, %v622_v33  ;;  %v623_v39 = vmul.f32 %v609_v30, %v514_v34  ;;  %v675_v29 = vld [vmem:[#allocation7 + $0x98] sm:$0xff]  ;;  %v613_v30 = vrot.slane %v1790_v23, %v1766_v45  ;;  %v639_v37 = vrot.slane %v1795_v24, %v1766_v45 }
 0x1d2   :  { %v475_v40 = vpop.f32.mrf.mxu0  ;;  %v516_v41 = vpop.f32.mrf.mxu1  ;;  %v759_v34 = vunpack.c.h.s8.bf16 %v675_v29 }
 0x1d3   :  { %v649_v42 = vadd.f32 %v635_v35, %v623_v39  ;;  %v652_v43 = vmax.f32 %v648_v38, 0.0  ;;  %v674_v35 = vld [vmem:[#allocation7 + $0x90] sm:$0xff]  ;;  %v617_v38 = vrot.slane %v1790_v23, %v1770_v48 }
 0x1d4   :  { %v758_v46 = vunpack.c.h.s8.bf16 %v674_v35  ;;  %v754_v23 = vunpack.c.l.s8.bf16 %v674_v35  ;;  %v715_v35 = vld [vmem:[#allocation7 + $0x1d8] sm:$0xff] }
 0x1d5   :  { %v653_v49 = vmax.f32 %v649_v42, 0.0  ;;  %v1805_v52 = vpack.c.bf16 %v652_v43, %v652_v43  ;;  %v643_v43 = vrot.slane %v1795_v24, %v1770_v48 }
 0x1d7   :  { %v849_v50 = vpack.c.bf16 %v653_v49, %v653_v49 }
 0x1d9   :  { %884 = vmatprep.mubr.bf16.mxu0 %v849_v50 }
 0x1da   :  { %885 = vmatmul.mubr.bf16.vlgmr.msra.gmra.mxu0 %v1805_v52 }
 0x1db   :  { %935 = vmatpush1.bf16.msra.mxu0 %v750_v51  ;;  %966 = vmatprep.mubr.bf16.mxu0 %v849_v50  ;;  %v755_v51 = vunpack.c.l.s8.bf16 %v675_v29  ;;  %v719_v29 = vld [vmem:[#allocation7 + $0x1f8] sm:$0xff] }
 0x1dc   :  { %936 = vmatprep.subr.bf16.mxu0 %v747_v53 }
 0x1df   :  { %937 = vmatpush1.bf16.msra.mxu0 %v746_v55 }
 0x1e0   :  { %938 = vmatprep.subr.bf16.mxu0 %v743_v56 }
 0x1e3   :  { %939 = vmatpush1.bf16.msra.mxu0 %v742_v58 }
 0x1e4   :  { %940 = vmatprep.subr.bf16.mxu0 %v739_v59  ;;  %v702_v59 = vld [vmem:[#allocation7 + $0x170] sm:$0xff] }
 0x1e5   :  { %v814_v24 = vunpack.c.h.s8.bf16 %v702_v59 }
 0x1e7   :  { %941 = vmatpush1.bf16.msra.mxu0 %v738_v61 }
 0x1e8   :  { %942 = vmatprep.subr.bf16.mxu0 %v735_v62 }
 0x1eb   :  { %943 = vmatpush1.bf16.msra.mxu0 %v734_v11  ;;  %v699_v11 = vld [vmem:[#allocation7 + $0x158] sm:$0xff] }
 0x1ec   :  { %944 = vmatprep.subr.bf16.mxu0 %v731_v12  ;;  %v810_v12 = vunpack.c.l.s8.bf16 %v702_v59  ;;  %v807_v0 = vunpack.c.h.s8.bf16 %v699_v11  ;;  %v803_v3 = vunpack.c.l.s8.bf16 %v699_v11  ;;  %v1537_v59 = vld [vmem:[#allocation9 + $0x10] sm:$0xff]   ;;  %v1542_v11 = vld [vmem:[#allocation9 + $0xf8] sm:$0xff]  }
 0x1ef   :  { %945 = vmatpush1.bf16.msra.mxu0 %v730_v1  ;;  %v698_v1 = vld [vmem:[#allocation7 + $0x150] sm:$0xff] }
 0x1f0   :  { %946 = vmatprep.subr.bf16.mxu0 %v727_v2  ;;  %v806_v2 = vunpack.c.h.s8.bf16 %v698_v1 }
 0x1f3   :  { %947 = vmatpush1.bf16.msra.mxu0 %v726_v4  ;;  %v1526_v4 = vld [vmem:[#allocation9 + $0x78] sm:$0xff]  }
 0x1f4   :  { %948 = vmatprep.subr.bf16.mxu0 %v723_v5  ;;  %v1527_v5 = vld [vmem:[#allocation9 + $0x38] sm:$0xff]  }
 0x1f7   :  { %949 = vmatpush1.bf16.msra.mxu0 %v722_v7  ;;  %v802_v7 = vunpack.c.l.s8.bf16 %v698_v1  ;;  %v1545_v1 = vld [vmem:[#allocation9 + $0xb0] sm:$0xff]  }
 0x1f8   :  { %950 = vmatprep.subr.bf16.mxu0 %v783_v8  ;;  %v1529_v8 = vld [vmem:[#allocation9 + $0x30] sm:$0xff]  }
 0x1fb   :  { %951 = vmatpush2.bf16.msra.mxu0 %v782_v10  ;;  %v1530_v10 = vld [vmem:[#allocation9 + $0x68] sm:$0xff]  }
 0x1fc   :  { %952 = vmatprep.subr.bf16.mxu0 %v779_v13  ;;  %v798_v13 = vunpack.c.h.s8.bf16 %v694_v9 }
 0x1ff   :  { %953 = vmatpush2.bf16.msra.mxu0 %v778_v15  ;;  %v795_v15 = vunpack.c.l.s8.bf16 %v695_v21 }
 0x200   :  { %954 = vmatprep.subr.bf16.mxu0 %v775_v16  ;;  %v1532_v16 = vld [vmem:[#allocation9 + $0x60] sm:$0xff]  }
 0x203   :  { %955 = vmatpush2.bf16.msra.mxu0 %v774_v18  ;;  %v794_v18 = vunpack.c.l.s8.bf16 %v694_v9 }
 0x204   :  { %956 = vmatprep.subr.bf16.mxu0 %v771_v19  ;;  %v1533_v19 = vld [vmem:[#allocation9 + $0x20] sm:$0xff]  }
 0x207   :  { %957 = vmatpush2.bf16.msra.mxu0 %v770_v22  ;;  %v690_v22 = vld [vmem:[#allocation7 + $0x110] sm:$0xff] }
 0x208   :  { %958 = vmatprep.subr.bf16.mxu0 %v767_v25  ;;  %v1534_v25 = vld [vmem:[#allocation9 + $0x58] sm:$0xff]   ;;  %v790_v26 = vunpack.c.h.s8.bf16 %v690_v22 }
 0x20b   :  { %959 = vmatpush2.bf16.msra.mxu0 %v766_v27  ;;  %v1535_v27 = vld [vmem:[#allocation9 + $0x18] sm:$0xff]  }
 0x20c   :  { %v552_v32 = vpop.f32.mrf.mxu0  ;;  %v593_v33 = vpop.f32.mrf.mxu1  ;;  %960 = vmatprep.subr.bf16.mxu0 %v763_v28  ;;  %v787_v28 = vunpack.c.l.s8.bf16 %v691_v17  ;;  %v1016_v17 = vld [vmem:[%s1850_s7] sm:$0xf] }
 0x20d   :  { %v594_v36 = vadd.f32 %v593_v33, %v552_v32  ;;  %v718_v32 = vld [vmem:[#allocation7 + $0x1f0] sm:$0xff] }
 0x20e   :  { %v554_v39 = vpop.f32.mrf.mxu0  ;;  %v595_v40 = vpop.f32.mrf.mxu1  ;;  %v846_v33 = vunpack.c.h.s8.bf16 %v718_v32 }
 0x20f   :  { %v624_v41 = vmul.f32 %v613_v30, %v594_v36  ;;  %v596_v42 = vadd.f32 %v595_v40, %v554_v39  ;;  %961 = vmatpush2.bf16.msra.mxu0 %v762_v31  ;;  %v786_v30 = vunpack.c.l.s8.bf16 %v690_v22  ;;  %v847_v31 = vunpack.c.h.s8.bf16 %v719_v29 }
 0x210   :  { %v556_v49 = vpop.f32.mrf.mxu0  ;;  %v597_v50 = vpop.f32.mrf.mxu1  ;;  %962 = vmatprep.subr.bf16.mxu0 %v759_v34  ;;  %v843_v34 = vunpack.c.l.s8.bf16 %v719_v29  ;;  %v842_v36 = vunpack.c.l.s8.bf16 %v718_v32  ;;  %v835_v40 = vunpack.c.l.s8.bf16 %v715_v35 }
 0x211   :  { %v650_v53 = vadd.f32 %v639_v37, %v624_v41  ;;  %v625_v54 = vmul.f32 %v617_v38, %v596_v42  ;;  %v839_v37 = vunpack.c.h.s8.bf16 %v715_v35  ;;  %v714_v38 = vld [vmem:[#allocation7 + $0x1d0] sm:$0xff]  ;;  %v711_v41 = vld [vmem:[#allocation7 + $0x1b8] sm:$0xff] }
 0x212   :  { %v557_v55 = vpop.f32.mrf.mxu0  ;;  %v598_v56 = vpop.f32.mrf.mxu1  ;;  %v838_v39 = vunpack.c.h.s8.bf16 %v714_v38  ;;  %v834_v42 = vunpack.c.l.s8.bf16 %v714_v38  ;;  %v827_v50 = vunpack.c.l.s8.bf16 %v711_v41 }
 0x213   :  { %v651_v57 = vadd.f32 %v643_v43, %v625_v54  ;;  %963 = vmatpush2.bf16.msra.mxu0 %v758_v46  ;;  %v654_v58 = vmax.f32 %v650_v53, 0.0  ;;  %v831_v43 = vunpack.c.h.s8.bf16 %v711_v41  ;;  %v710_v46 = vld [vmem:[#allocation7 + $0x1b0] sm:$0xff] }
 0x214   :  { %964 = vmatprep.subr.bf16.mxu0 %v755_v51  ;;  %v830_v49 = vunpack.c.h.s8.bf16 %v710_v46  ;;  %v707_v51 = vld [vmem:[#allocation7 + $0x198] sm:$0xff]  ;;  %v826_v53 = vunpack.c.l.s8.bf16 %v710_v46  ;;  %v706_v55 = vld [vmem:[#allocation7 + $0x190] sm:$0xff] }
 0x215   :  { %v655_v60 = vmax.f32 %v651_v57, 0.0  ;;  %v1817_v62 = vpack.c.bf16 %v654_v58, %v654_v58  ;;  %v823_v54 = vunpack.c.h.s8.bf16 %v707_v51  ;;  %v822_v56 = vunpack.c.h.s8.bf16 %v706_v55  ;;  %v1536_v58 = vld [vmem:[#allocation9 + $0x50] sm:$0xff]  }
 0x216   :  { %v819_v57 = vunpack.c.l.s8.bf16 %v707_v51 }
 0x217   :  { %965 = vmatpush2.bf16.msra.mxu0 %v754_v23  ;;  %v851_v61 = vpack.c.bf16 %v655_v60, %v655_v60  ;;  %v818_v23 = vunpack.c.l.s8.bf16 %v706_v55  ;;  %v1538_v60 = vld [vmem:[#allocation9 + $0x48] sm:$0xff]  }
 0x218   :  { %1466 = vmatprep.subr.bf16.mxu0 %v1526_v4  ;;  %v1549_v4 = vld [vmem:[#allocation9 + $0xa0] sm:$0xff]  }
 0x219   :  { %925 = vmatprep.mubr.bf16.mxu1 %v851_v61 }
 0x21a   :  { %926 = vmatmul.mubr.bf16.vlgmr.msra.gmra.mxu1 %v1817_v62  ;;  %967 = vmatmul.mubr.bf16.vlgmr.msra.gmra.mxu0 %v1805_v52  ;;  %v799_v52 = vunpack.c.h.s8.bf16 %v695_v21 }
 0x21b   :  { %976 = vmatpush1.bf16.msra.mxu1 %v814_v24  ;;  %1007 = vmatprep.mubr.bf16.mxu1 %v851_v61  ;;  %v1539_v61 = vld [vmem:[#allocation9 + $0x8] sm:$0xff]   ;;  %v1540_v24 = vld [vmem:[#allocation9 + $0x40] sm:$0xff]  }
 0x21c   :  { %977 = vmatprep.subr.bf16.mxu1 %v811_v63  ;;  %1467 = vmatpush3.bf16.msra.mxu0 %v1527_v5  ;;  %v1541_v63 = vld [vmem:[#allocation9] sm:$0xff]   ;;  %v1550_v5 = vld [vmem:[#allocation9 + $0xd8] sm:$0xff]  }
 0x21d   :  { %1468 = vmatprep.subr.bf16.mxu0 %v1528_v6  ;;  %v1551_v6 = vld [vmem:[#allocation9 + $0x98] sm:$0xff]  }
 0x21f   :  { %978 = vmatpush1.bf16.msra.mxu1 %v810_v12  ;;  %v1543_v12 = vld [vmem:[#allocation9 + $0xb8] sm:$0xff]  }
 0x220   :  { %979 = vmatprep.subr.bf16.mxu1 %v807_v0  ;;  %1469 = vmatpush3.bf16.msra.mxu0 %v1529_v8  ;;  %v1544_v0 = vld [vmem:[#allocation9 + $0xf0] sm:$0xff]  }
 0x221   :  { %1470 = vmatprep.subr.bf16.mxu0 %v1530_v10  ;;  %v1553_v8 = vld [vmem:[#allocation9 + $0x90] sm:$0xff]   ;;  %v1554_v10 = vld [vmem:[#allocation9 + $0xc8] sm:$0xff]  }
 0x223   :  { %980 = vmatpush1.bf16.msra.mxu1 %v806_v2  ;;  %v1547_v2 = vld [vmem:[#allocation9 + $0xa8] sm:$0xff]  }
 0x224   :  { %981 = vmatprep.subr.bf16.mxu1 %v803_v3  ;;  %1471 = vmatpush3.bf16.msra.mxu0 %v1531_v14  ;;  %v1548_v3 = vld [vmem:[#allocation9 + $0xe0] sm:$0xff]  }
 0x225   :  { %1472 = vmatprep.subr.bf16.mxu0 %v1532_v16  ;;  %v1557_v16 = vld [vmem:[#allocation9 + $0x80] sm:$0xff]  }
 0x227   :  { %982 = vmatpush1.bf16.msra.mxu1 %v802_v7  ;;  %v1552_v7 = vld [vmem:[#allocation9 + $0xd0] sm:$0xff]  }
 0x228   :  { %983 = vmatprep.subr.bf16.mxu1 %v799_v52  ;;  %1473 = vmatpush3.bf16.msra.mxu0 %v1533_v19  ;;  %v1021_v19 = vrot.slane %v1016_v17, %v1764_v44 }
 0x229   :  { %1474 = vmatprep.subr.bf16.mxu0 %v1534_v25 }
 0x22b   :  { %984 = vmatpush1.bf16.msra.mxu1 %v798_v13  ;;  %v1555_v13 = vld [vmem:[#allocation9 + $0x88] sm:$0xff]  }
 0x22c   :  { %985 = vmatprep.subr.bf16.mxu1 %v795_v15  ;;  %1475 = vmatpush3.bf16.msra.mxu0 %v1535_v27  ;;  %v1556_v15 = vld [vmem:[#allocation9 + $0xc0] sm:$0xff]   ;;  %v1025_v27 = vrot.slane %v1016_v17, %v1768_v47 }
 0x22d   :  { %1476 = vmatprep.subr.bf16.mxu0 %v1536_v58 }
 0x22f   :  { %986 = vmatpush1.bf16.msra.mxu1 %v794_v18  ;;  %v1042_v18 = vld [vmem:[%s1851_s8] sm:$0xf] }
 0x230   :  { %987 = vmatprep.subr.bf16.mxu1 %v791_v20  ;;  %1477 = vmatpush3.bf16.msra.mxu0 %v1537_v59  ;;  %v1051_v32 = vrot.slane %v1042_v18, %v1768_v47  ;;  %v1033_v47 = vrot.slane %v1016_v17, %v1770_v48  ;;  %v1059_v55 = vrot.slane %v1042_v18, %v1770_v48  ;;  %v1433_v48 = vld [vmem:[%s1853_s10] ss:$0 sm:$0xff] }
 0x231   :  { %1478 = vmatprep.subr.bf16.mxu0 %v1538_v60 }
 0x233   :  { %988 = vmatpush1.bf16.msra.mxu1 %v790_v26  ;;  %v1047_v26 = vrot.slane %v1042_v18, %v1764_v44  ;;  %v1029_v44 = vrot.slane %v1016_v17, %v1766_v45 }
 0x234   :  { %989 = vmatprep.subr.bf16.mxu1 %v787_v28  ;;  %1479 = vmatpush3.bf16.msra.mxu0 %v1539_v61 }
 0x235   :  { %1480 = vmatprep.subr.bf16.mxu0 %v1540_v24 }
 0x237   :  { %990 = vmatpush1.bf16.msra.mxu1 %v786_v30 }
 0x238   :  { %991 = vmatprep.subr.bf16.mxu1 %v847_v31  ;;  %1481 = vmatpush3.bf16.msra.mxu0 %v1541_v63 }
 0x23b   :  { %992 = vmatpush2.bf16.msra.mxu1 %v846_v33 }
 0x23c   :  { %993 = vmatprep.subr.bf16.mxu1 %v843_v34 }
 0x23f   :  { %994 = vmatpush2.bf16.msra.mxu1 %v842_v36 }
 0x240   :  { %995 = vmatprep.subr.bf16.mxu1 %v839_v37 }
 0x243   :  { %996 = vmatpush2.bf16.msra.mxu1 %v838_v39 }
 0x244   :  { %997 = vmatprep.subr.bf16.mxu1 %v835_v40 }
 0x247   :  { %998 = vmatpush2.bf16.msra.mxu1 %v834_v42 }
 0x248   :  { %999 = vmatprep.subr.bf16.mxu1 %v831_v43 }
 0x24b   :  { %1000 = vmatpush2.bf16.msra.mxu1 %v830_v49 }
 0x24c   :  { %1001 = vmatprep.subr.bf16.mxu1 %v827_v50  ;;  %v1055_v50 = vrot.slane %v1042_v18, %v1766_v45 }
 0x24f   :  { %1002 = vmatpush2.bf16.msra.mxu1 %v826_v53 }
 0x250   :  { %1003 = vmatprep.subr.bf16.mxu1 %v823_v54 }
 0x253   :  { %1004 = vmatpush2.bf16.msra.mxu1 %v822_v56 }
 0x254   :  { %1005 = vmatprep.subr.bf16.mxu1 %v819_v57 }
 0x257   :  { %1006 = vmatpush2.bf16.msra.mxu1 %v818_v23 }
 0x258   :  { %1488 = vmatprep.subr.bf16.mxu1 %v1542_v11 }
 0x25a   :  { %1008 = vmatmul.mubr.bf16.vlgmr.msra.gmra.mxu1 %v1817_v62  ;;  %v1546_v62 = vld [vmem:[#allocation9 + $0xe8] sm:$0xff]  }
 0x25b   :  { %1489 = vmatpush3.bf16.msra.mxu1 %v1543_v12 }
 0x25c   :  { %1490 = vmatprep.subr.bf16.mxu1 %v1544_v0 }
 0x25f   :  { %1491 = vmatpush3.bf16.msra.mxu1 %v1545_v1 }
 0x260   :  { %1492 = vmatprep.subr.bf16.mxu1 %v1546_v62 }
 0x263   :  { %1493 = vmatpush3.bf16.msra.mxu1 %v1547_v2 }
 0x264   :  { %1494 = vmatprep.subr.bf16.mxu1 %v1548_v3 }
 0x267   :  { %1495 = vmatpush3.bf16.msra.mxu1 %v1549_v4 }
 0x268   :  { %1496 = vmatprep.subr.bf16.mxu1 %v1550_v5 }
 0x26b   :  { %1497 = vmatpush3.bf16.msra.mxu1 %v1551_v6 }
 0x26c   :  { %1498 = vmatprep.subr.bf16.mxu1 %v1552_v7 }
 0x26f   :  { %1499 = vmatpush3.bf16.msra.mxu1 %v1553_v8 }
 0x270   :  { %1500 = vmatprep.subr.bf16.mxu1 %v1554_v10 }
 0x273   :  { %1501 = vmatpush3.bf16.msra.mxu1 %v1555_v13 }
 0x274   :  { %1502 = vmatprep.subr.bf16.mxu1 %v1556_v15 }
 0x277   :  { %1503 = vmatpush3.bf16.msra.mxu1 %v1557_v16 }
 0x29a   :  { %v886_v21 = vpop.f32.mrf.mxu0 }
 0x29c   :  { %v888_v52 = vpop.f32.mrf.mxu0 }
 0x29e   :  { %v890_v9 = vpop.f32.mrf.mxu0 }
 0x2a0   :  { %v891_v14 = vpop.f32.mrf.mxu0 }
 0x2da   :  { %v927_v20 = vpop.f32.mrf.mxu1  ;;  %v968_v22 = vpop.f32.mrf.mxu0 }
 0x2db   :  { %v928_v25 = vadd.f32 %v927_v20, %v886_v21 }
 0x2dc   :  { %v929_v28 = vpop.f32.mrf.mxu1  ;;  %v970_v29 = vpop.f32.mrf.mxu0 }
 0x2dd   :  { %v1038_v30 = vmul.f32 %v1021_v19, %v928_v25  ;;  %v930_v31 = vadd.f32 %v929_v28, %v888_v52 }
 0x2de   :  { %v931_v33 = vpop.f32.mrf.mxu1  ;;  %v972_v34 = vpop.f32.mrf.mxu0 }
 0x2df   :  { %v1064_v35 = vadd.f32 %v1047_v26, %v1038_v30  ;;  %v1039_v36 = vmul.f32 %v1025_v27, %v930_v31 }
 0x2e0   :  { %v932_v37 = vpop.f32.mrf.mxu1  ;;  %v973_v38 = vpop.f32.mrf.mxu0 }
 0x2e1   :  { %v1065_v39 = vadd.f32 %v1051_v32, %v1039_v36  ;;  %v1068_v40 = vmax.f32 %v1064_v35, 0.0 }
 0x2e3   :  { %v1069_v41 = vmax.f32 %v1065_v39, 0.0  ;;  %v1072_v43 = vpack.c.bf16 %v1068_v40, %v1068_v40 }
 0x2e5   :  { %v1073_v42 = vpack.c.bf16 %v1069_v41, %v1069_v41 }
 0x2e7   :  { %1371 = vmatprep.mubr.bf16.mxu0 %v1073_v42 }
 0x2e8   :  { %1372 = vmatmul.mubr.bf16.vlgmr.msra.gmra.mxu0 %v1072_v43 }
 0x31a   :  { %v1009_v46 = vpop.f32.mrf.mxu1 }
 0x31b   :  { %v1010_v49 = vadd.f32 %v1009_v46, %v968_v22 }
 0x31c   :  { %v1011_v51 = vpop.f32.mrf.mxu1 }
 0x31d   :  { %v1040_v53 = vmul.f32 %v1029_v44, %v1010_v49  ;;  %v1012_v54 = vadd.f32 %v1011_v51, %v970_v29 }
 0x31e   :  { %v1013_v56 = vpop.f32.mrf.mxu1 }
 0x31f   :  { %v1066_v57 = vadd.f32 %v1055_v50, %v1040_v53  ;;  %v1041_v23 = vmul.f32 %v1033_v47, %v1012_v54 }
 0x320   :  { %v1014_v58 = vpop.f32.mrf.mxu1 }
 0x321   :  { %v1067_v59 = vadd.f32 %v1059_v55, %v1041_v23  ;;  %v1070_v60 = vmax.f32 %v1066_v57, 0.0 }
 0x323   :  { %v1071_v61 = vmax.f32 %v1067_v59, 0.0  ;;  %v1074_v63 = vpack.c.bf16 %v1070_v60, %v1070_v60 }
 0x325   :  { %v1075_v24 = vpack.c.bf16 %v1071_v61, %v1071_v61 }
 0x327   :  { %1411 = vmatprep.mubr.bf16.mxu1 %v1075_v24 }
 0x328   :  { %1412 = vmatmul.mubr.bf16.vlgmr.msra.gmra.mxu1 %v1074_v63 }
 0x3a8   :  { %v1482_v11 = vpop.f32.mrf.mxu0 }
 0x3aa   :  { %v1483_v45 = vpop.f32.mrf.mxu0 }
 0x3ab   :  { %v1484_v1 = vadd.f32 %v1483_v45, %v1482_v11 }
 0x3ac   :  { %v1485_v12 = vpop.f32.mrf.mxu0 }
 0x3ad   :  { %v1374_v3 = vadd.f32 %v1484_v1, %v1433_v48 }
 0x3ae   :  { %v1486_v0 = vpop.f32.mrf.mxu0 }
 0x3e8   :  { %v1504_v62 = vpop.f32.mrf.mxu1 }
 0x3ea   :  { %v1505_v2 = vpop.f32.mrf.mxu1 }
 0x3eb   :  { %v1506_v4 = vadd.f32 %v1505_v2, %v1504_v62 }
 0x3ec   :  { %v1507_v5 = vpop.f32.mrf.mxu1 }
 0x3ed   :  { %v1414_v6 = vadd.f32 %v1506_v4, %v1374_v3 }
 0x3ee   :  { %v1508_v21 = vpop.f32.mrf.mxu1 }
 0x3ef   :  { %1419 = vst [vmem:[%s1854_s11] sm:$0xff] %v1414_v6 }
 0x3f0   :  { %1424 = vsyncpa [#allocation3], 1 }
 0x3f1   :  { %1425 = vsyncpa [#allocation5], 1 }
 0x3f2   :  { %1426 = vsyncpa [#allocation8], 1 }

</bundles_post_ra>
